<compile_context>
chip_gen: v7x
topology: tpu7x:2x2x1
jax: 0.10.0
libtpu: 0.0.40
codegen_flags: <defaults>
</compile_context>

<pallas_src>
import functools
import math

import jax
import jax.numpy as jnp
from jax import lax
from jax.experimental import pallas as pl
from jax.experimental.pallas import tpu as pltpu


LN_EPS = 1e-6  # matches nn.LayerNorm(dModel, eps=1e-06) in the reference module


# -----------------------------------------------------------------------------
# In-kernel helpers (operate on jnp values already resident in VMEM/vregs)
# -----------------------------------------------------------------------------
def _layer_norm(x, gamma, beta, eps):
    mean = jnp.mean(x, axis=-1, keepdims=True)
    xc = x - mean
    var = jnp.mean(xc * xc, axis=-1, keepdims=True)
    return xc * lax.rsqrt(var + eps) * gamma + beta


def _mish(y):
    # mish(y) = y * tanh(softplus(y)) = y * ((1+e^y)^2 - 1) / ((1+e^y)^2 + 1)
    # -> one exp per element (vs exp+log1p+tanh). Clamp keeps (1+t)^2 finite; where
    # the clamp is active the ratio is already 1.0 to f32 precision.
    t = jnp.exp(jnp.minimum(y, 20.0))
    u = 1.0 + t
    u2 = u * u
    return y * (u2 - 1.0) / (u2 + 1.0)


# -----------------------------------------------------------------------------
# Pallas kernels
# -----------------------------------------------------------------------------
def _pre_ln_kernel(x_ref, g_ref, b_ref, o_ref, *, eps):
    x = x_ref[0].astype(jnp.float32)                                   # (S, D)
    o_ref[0] = _layer_norm(x, g_ref[...], b_ref[...], eps).astype(o_ref.dtype)


def _encode_layer_kernel(h_ref, wqkv_ref, bqkv_ref, wo_ref, bo_ref,
                         w1_ref, b1_ref, w2_ref, b2_ref,
                         ln1_g_ref, ln1_b_ref, ln2_g_ref, ln2_b_ref,
                         o_ref, *, head, dim, eps):
    S = h_ref.shape[1]
    D = h_ref.shape[2]
    HD = head * dim
    scale = 1.0 / math.sqrt(dim)

    h = h_ref[0].astype(jnp.float32)                                   # (S, D)

    # ---- fused QKV projection: one MXU pass over the concatenated weight ----
    qkv = jnp.dot(h, wqkv_ref[...], preferred_element_type=jnp.float32) + bqkv_ref[...]
    q = qkv[:, :HD] * scale            # fold 1/sqrt(dim) into q once
    k = qkv[:, HD:2 * HD]
    v = qkv[:, 2 * HD:]

    # ---- multi-head self-attention, all heads in VMEM.
    # concat-over-heads is folded into the output projection as a sum of
    # per-head (S,dim) @ Wo[h*dim:(h+1)*dim, :] contributions.
    wo = wo_ref[...]                                                   # (HD, D)
    proj = None
    for hh in range(head):                                             # static unroll
        lo = hh * dim
        q_h = q[:, lo:lo + dim]
        k_h = k[:, lo:lo + dim]
        v_h = v[:, lo:lo + dim]
        # q @ k^T without materializing a transpose: contract last dims.
        s = lax.dot_general(q_h, k_h, (((1,), (1,)), ((), ())),
                            preferred_element_type=jnp.float32)        # (S, S)
        s = s - jnp.max(s, axis=-1, keepdims=True)
        p = jnp.exp(s)
        p = p * pl.reciprocal(jnp.sum(p, axis=-1, keepdims=True), approx=True)
        a_h = jnp.dot(p, v_h, preferred_element_type=jnp.float32)      # (S, dim)
        c = jnp.dot(a_h, wo[lo:lo + dim, :], preferred_element_type=jnp.float32)
        proj = c if proj is None else proj + c
    proj = proj + bo_ref[...]

    # ---- residual + LayerNorm 1 (fused, stays in VMEM) ----
    x = _layer_norm(h + proj, ln1_g_ref[...], ln1_b_ref[...], eps)

    # ---- feed-forward: W2 @ Mish(W1 @ x) ----
    y = jnp.dot(x, w1_ref[...], preferred_element_type=jnp.float32) + b1_ref[...]
    y = _mish(y)
    y = jnp.dot(y, w2_ref[...], preferred_element_type=jnp.float32) + b2_ref[...]

    # ---- residual + LayerNorm 2 (fused) ----
    o_ref[0] = _layer_norm(x + y, ln2_g_ref[...], ln2_b_ref[...], eps).astype(o_ref.dtype)


# -----------------------------------------------------------------------------
# pallas_call wrappers
# -----------------------------------------------------------------------------
def _full_spec(shape):
    zeros = (0,) * len(shape)
    return pl.BlockSpec(shape, lambda b: zeros)


def pallas_pre_layernorm(x, gamma, beta, eps=LN_EPS):
    B, S, D = x.shape
    kern = functools.partial(_pre_ln_kernel, eps=eps)
    return pl.pallas_call(
        kern,
        out_shape=jax.ShapeDtypeStruct((B, S, D), x.dtype),
        grid=(B,),
        in_specs=[
            pl.BlockSpec((1, S, D), lambda b: (b, 0, 0)),
            _full_spec((1, D)),
            _full_spec((1, D)),
        ],
        out_specs=pl.BlockSpec((1, S, D), lambda b: (b, 0, 0)),
        compiler_params=pltpu.CompilerParams(dimension_semantics=("parallel",)),
    )(x, gamma.reshape(1, D), beta.reshape(1, D))


def pallas_encode_layer(h, p, *, head, dim, eps=LN_EPS):
    B, S, D = h.shape
    HD = head * dim
    hidden = p["W1"].shape[1]
    kern = functools.partial(_encode_layer_kernel, head=head, dim=dim, eps=eps)
    return pl.pallas_call(
        kern,
        out_shape=jax.ShapeDtypeStruct((B, S, D), h.dtype),
        grid=(B,),
        in_specs=[
            pl.BlockSpec((1, S, D), lambda b: (b, 0, 0)),   # activations
            _full_spec((D, 3 * HD)),                        # Wqkv (fused)
            _full_spec((1, 3 * HD)),                        # bqkv
            _full_spec((HD, D)),                            # Wo
            _full_spec((1, D)),                             # bo
            _full_spec((D, hidden)),                        # W1
            _full_spec((1, hidden)),                        # b1
            _full_spec((hidden, D)),                        # W2
            _full_spec((1, D)),                             # b2
            _full_spec((1, D)),                             # ln1_g
            _full_spec((1, D)),                             # ln1_b
            _full_spec((1, D)),                             # ln2_g
            _full_spec((1, D)),                             # ln2_b
        ],
        out_specs=pl.BlockSpec((1, S, D), lambda b: (b, 0, 0)),
        compiler_params=pltpu.CompilerParams(dimension_semantics=("parallel",)),
    )(h, p["Wqkv"], p["bqkv"].reshape(1, -1), p["Wo"], p["bo"].reshape(1, -1),
      p["W1"], p["b1"].reshape(1, -1), p["W2"], p["b2"].reshape(1, -1),
      p["ln1_g"].reshape(1, -1), p["ln1_b"].reshape(1, -1),
      p["ln2_g"].reshape(1, -1), p["ln2_b"].reshape(1, -1))


# -----------------------------------------------------------------------------
# Model: parameter init + forward
# -----------------------------------------------------------------------------
def init_params(key, blocks, head, dModel, dim, hidden):
    HD = head * dim

    def dense(k, fan_in, fan_out):
        w = jax.random.normal(k, (fan_in, fan_out), jnp.float32) * 0.02
        b = jnp.zeros((fan_out,), jnp.float32)
        return w, b

    params = {
        "ln_g": jnp.ones((dModel,), jnp.float32),
        "ln_b": jnp.zeros((dModel,), jnp.float32),
        "blocks": [],
    }
    for bi in range(blocks):
        keys = jax.random.split(jax.random.fold_in(key, bi), 4)
        Wqkv, bqkv = dense(keys[0], dModel, 3 * HD)     # concatenated q|k|v projection
        Wo, bo = dense(keys[1], HD, dModel)
        W1, b1 = dense(keys[2], dModel, hidden)
        W2, b2 = dense(keys[3], hidden, dModel)
        params["blocks"].append(dict(
            Wqkv=Wqkv, bqkv=bqkv, Wo=Wo, bo=bo, W1=W1, b1=b1, W2=W2, b2=b2,
            ln1_g=jnp.ones((dModel,), jnp.float32),
            ln1_b=jnp.zeros((dModel,), jnp.float32),
            ln2_g=jnp.ones((dModel,), jnp.float32),
            ln2_b=jnp.zeros((dModel,), jnp.float32),
        ))
    return params


def chaotic_encoder_forward(x, params, head, dim, mask=None):
    # TODO(synk): attention mask not supported; only the default mask=None path.
    assert mask is None
    h = pallas_pre_layernorm(x, params["ln_g"], params["ln_b"])
    for blk in params["blocks"]:
        h = pallas_encode_layer(h, blk, head=head, dim=dim)
    return h


# -----------------------------------------------------------------------------
# Pure-JAX reference (for in-script numerical validation)
# -----------------------------------------------------------------------------
def reference_forward(x, params, head, dim):
    def ln(v, g, b):
        m = v.mean(-1, keepdims=True)
        var = ((v - m) ** 2).mean(-1, keepdims=True)
        return (v - m) / jnp.sqrt(var + LN_EPS) * g + b

    def mish(v):
        return v * jnp.tanh(jax.nn.softplus(v))

    B, S, D = x.shape
    HD = head * dim
    h = ln(x, params["ln_g"], params["ln_b"])
    for p in params["blocks"]:
        qkv = h @ p["Wqkv"] + p["bqkv"]
        q, k, v = qkv[..., :HD], qkv[..., HD:2 * HD], qkv[..., 2 * HD:]

        def split(t):
            return t.reshape(B, S, head, dim).transpose(0, 2, 1, 3)

        qh, kh, vh = split(q), split(k), split(v)
        s = jnp.einsum("bhqd,bhkd->bhqk", qh, kh) / math.sqrt(dim)
        pa = jax.nn.softmax(s, axis=-1)
        a = jnp.einsum("bhqk,bhkd->bhqd", pa, vh)
        a = a.transpose(0, 2, 1, 3).reshape(B, S, HD)
        attn_out = a @ p["Wo"] + p["bo"]
        h = ln(h + attn_out, p["ln1_g"], p["ln1_b"])
        ff = mish(h @ p["W1"] + p["b1"]) @ p["W2"] + p["b2"]
        h = ln(h + ff, p["ln2_g"], p["ln2_b"])
    return h


# -----------------------------------------------------------------------------
if __name__ == "__main__":
    blocks, head, dModel, dim, hidden = 2, 4, 32, 8, 64
    B, S = 2, 8

    key = jax.random.PRNGKey(0)
    kx, kp = jax.random.split(key)
    x = jax.random.normal(kx, (B, S, dModel), jnp.float32)
    params = init_params(kp, blocks, head, dModel, dim, hidden)

    fwd = jax.jit(functools.partial(chaotic_encoder_forward, head=head, dim=dim))
    out = fwd(x, params)
    jax.block_until_ready(out)

    assert out.shape == (B, S, dModel) and out.dtype == jnp.float32
    assert bool(jnp.all(jnp.isfinite(out)))

    ref = reference_forward(x, params, head, dim)
    assert bool(jnp.allclose(out, ref, atol=5e-2, rtol=5e-2)), (
        f"max abs diff {float(jnp.max(jnp.abs(out - ref)))}"
    )

    print("KERNEL_OK")
</pallas_src>

<mosaic_0001>
module attributes {stable_mosaic.version = 11 : i64} {
  func.func @_pre_ln_kernel(%arg0: i32, %arg1: memref<1x8x32xf32, #tpu.memory_space<vmem>>, %arg2: memref<1x32xf32, #tpu.memory_space<vmem>>, %arg3: memref<1x32xf32, #tpu.memory_space<vmem>>, %arg4: memref<1x8x32xf32, #tpu.memory_space<vmem>>) attributes {dimension_semantics = [#tpu.dimension_semantics<parallel>], iteration_bounds = array<i64: 2>, scalar_prefetch = 0 : i64, scratch_operands = 0 : i64, tpu.core_type = #tpu.core_type<tc>, window_params = [{transform_indices = @transform_0, window_bounds = array<i64: 1, 8, 32>}, {pipeline_mode = #tpu.pipeline_mode<synchronous>, transform_indices = @transform_1, window_bounds = array<i64: 1, 32>}, {pipeline_mode = #tpu.pipeline_mode<synchronous>, transform_indices = @transform_2, window_bounds = array<i64: 1, 32>}, {transform_indices = @transform_3, window_bounds = array<i64: 1, 8, 32>}]} {
    %c0 = arith.constant 0 : index
    %c0_0 = arith.constant 0 : index
    %c0_1 = arith.constant 0 : index
    %0 = vector.load %arg1[%c0, %c0_0, %c0_1] : memref<1x8x32xf32, #tpu.memory_space<vmem>>, vector<1x8x32xf32>
    %1 = vector.shape_cast %0 : vector<1x8x32xf32> to vector<8x32xf32>
    %c0_2 = arith.constant 0 : index
    %c0_3 = arith.constant 0 : index
    %2 = vector.load %arg2[%c0_2, %c0_3] : memref<1x32xf32, #tpu.memory_space<vmem>>, vector<1x32xf32>
    %c0_4 = arith.constant 0 : index
    %c0_5 = arith.constant 0 : index
    %3 = vector.load %arg3[%c0_4, %c0_5] : memref<1x32xf32, #tpu.memory_space<vmem>>, vector<1x32xf32>
    %cst = arith.constant dense<0.000000e+00> : vector<8xf32>
    %4 = vector.multi_reduction <add>, %1, %cst [1] : vector<8x32xf32> to vector<8xf32>
    %5 = vector.shape_cast %4 : vector<8xf32> to vector<8x1xf32>
    %cst_6 = arith.constant 3.200000e+01 : f32
    %6 = vector.broadcast %cst_6 : f32 to vector<8x1xf32>
    %7 = arith.divf %5, %6 : vector<8x1xf32>
    %8 = vector.broadcast %7 : vector<8x1xf32> to vector<8x32xf32>
    %9 = arith.subf %1, %8 : vector<8x32xf32>
    %10 = arith.mulf %9, %9 : vector<8x32xf32>
    %cst_7 = arith.constant dense<0.000000e+00> : vector<8xf32>
    %11 = vector.multi_reduction <add>, %10, %cst_7 [1] : vector<8x32xf32> to vector<8xf32>
    %12 = vector.shape_cast %11 : vector<8xf32> to vector<8x1xf32>
    %cst_8 = arith.constant 3.200000e+01 : f32
    %13 = vector.broadcast %cst_8 : f32 to vector<8x1xf32>
    %14 = arith.divf %12, %13 : vector<8x1xf32>
    %cst_9 = arith.constant 9.99999997E-7 : f32
    %15 = vector.broadcast %cst_9 : f32 to vector<8x1xf32>
    %16 = arith.addf %14, %15 : vector<8x1xf32>
    %17 = math.rsqrt %16 : vector<8x1xf32>
    %18 = vector.broadcast %17 : vector<8x1xf32> to vector<8x32xf32>
    %19 = arith.mulf %9, %18 : vector<8x32xf32>
    %20 = vector.broadcast %2 : vector<1x32xf32> to vector<8x32xf32>
    %21 = arith.mulf %19, %20 : vector<8x32xf32>
    %22 = vector.broadcast %3 : vector<1x32xf32> to vector<8x32xf32>
    %23 = arith.addf %21, %22 : vector<8x32xf32>
    %c0_10 = arith.constant 0 : index
    %c0_11 = arith.constant 0 : index
    %c0_12 = arith.constant 0 : index
    %24 = vector.load %arg4[%c0_10, %c0_11, %c0_12] : memref<1x8x32xf32, #tpu.memory_space<vmem>>, vector<1x8x32xf32>
    %25 = vector.shape_cast %24 : vector<1x8x32xf32> to vector<8x32xf32>
    %26 = vector.shape_cast %23 : vector<8x32xf32> to vector<1x8x32xf32>
    tpu.vector_store %arg4[%c0_10, %c0_11, %c0_12], %26 {strides = array<i32>} : memref<1x8x32xf32, #tpu.memory_space<vmem>>, vector<1x8x32xf32>,
    return
  }
  func.func @transform_0(%arg0: i32) -> (i32, i32, i32) {
    %c0_i32 = arith.constant 0 : i32
    %c0_i32_0 = arith.constant 0 : i32
    %c0_i32_1 = arith.constant 0 : i32
    return %arg0, %c0_i32, %c0_i32_0 : i32, i32, i32
  }
  func.func @transform_1(%arg0: i32) -> (i32, i32) {
    %c0_i32 = arith.constant 0 : i32
    %c0_i32_0 = arith.constant 0 : i32
    %c0_i32_1 = arith.constant 0 : i32
    return %c0_i32, %c0_i32_0 : i32, i32
  }
  func.func @transform_2(%arg0: i32) -> (i32, i32) {
    %c0_i32 = arith.constant 0 : i32
    %c0_i32_0 = arith.constant 0 : i32
    %c0_i32_1 = arith.constant 0 : i32
    return %c0_i32, %c0_i32_0 : i32, i32
  }
  func.func @transform_3(%arg0: i32) -> (i32, i32, i32) {
    %c0_i32 = arith.constant 0 : i32
    %c0_i32_0 = arith.constant 0 : i32
    %c0_i32_1 = arith.constant 0 : i32
    return %arg0, %c0_i32, %c0_i32_0 : i32, i32, i32
  }
}

module attributes {stable_mosaic.version = 11 : i64} {
  func.func @_encode_layer_kernel(%arg0: i32, %arg1: memref<1x8x32xf32, #tpu.memory_space<vmem>>, %arg2: memref<32x96xf32, #tpu.memory_space<vmem>>, %arg3: memref<1x96xf32, #tpu.memory_space<vmem>>, %arg4: memref<32x32xf32, #tpu.memory_space<vmem>>, %arg5: memref<1x32xf32, #tpu.memory_space<vmem>>, %arg6: memref<32x64xf32, #tpu.memory_space<vmem>>, %arg7: memref<1x64xf32, #tpu.memory_space<vmem>>, %arg8: memref<64x32xf32, #tpu.memory_space<vmem>>, %arg9: memref<1x32xf32, #tpu.memory_space<vmem>>, %arg10: memref<1x32xf32, #tpu.memory_space<vmem>>, %arg11: memref<1x32xf32, #tpu.memory_space<vmem>>, %arg12: memref<1x32xf32, #tpu.memory_space<vmem>>, %arg13: memref<1x32xf32, #tpu.memory_space<vmem>>, %arg14: memref<1x8x32xf32, #tpu.memory_space<vmem>>) attributes {dimension_semantics = [#tpu.dimension_semantics<parallel>], iteration_bounds = array<i64: 2>, scalar_prefetch = 0 : i64, scratch_operands = 0 : i64, tpu.core_type = #tpu.core_type<tc>, window_params = [{transform_indices = @transform_0, window_bounds = array<i64: 1, 8, 32>}, {pipeline_mode = #tpu.pipeline_mode<synchronous>, transform_indices = @transform_1, window_bounds = array<i64: 32, 96>}, {pipeline_mode = #tpu.pipeline_mode<synchronous>, transform_indices = @transform_2, window_bounds = array<i64: 1, 96>}, {pipeline_mode = #tpu.pipeline_mode<synchronous>, transform_indices = @transform_3, window_bounds = array<i64: 32, 32>}, {pipeline_mode = #tpu.pipeline_mode<synchronous>, transform_indices = @transform_4, window_bounds = array<i64: 1, 32>}, {pipeline_mode = #tpu.pipeline_mode<synchronous>, transform_indices = @transform_5, window_bounds = array<i64: 32, 64>}, {pipeline_mode = #tpu.pipeline_mode<synchronous>, transform_indices = @transform_6, window_bounds = array<i64: 1, 64>}, {pipeline_mode = #tpu.pipeline_mode<synchronous>, transform_indices = @transform_7, window_bounds = array<i64: 64, 32>}, {pipeline_mode = #tpu.pipeline_mode<synchronous>, transform_indices = @transform_8, window_bounds = array<i64: 1, 32>}, {pipeline_mode = #tpu.pipeline_mode<synchronous>, transform_indices = @transform_9, window_bounds = array<i64: 1, 32>}, {pipeline_mode = #tpu.pipeline_mode<synchronous>, transform_indices = @transform_10, window_bounds = array<i64: 1, 32>}, {pipeline_mode = #tpu.pipeline_mode<synchronous>, transform_indices = @transform_11, window_bounds = array<i64: 1, 32>}, {pipeline_mode = #tpu.pipeline_mode<synchronous>, transform_indices = @transform_12, window_bounds = array<i64: 1, 32>}, {transform_indices = @transform_13, window_bounds = array<i64: 1, 8, 32>}]} {
    %c0 = arith.constant 0 : index
    %c0_0 = arith.constant 0 : index
    %c0_1 = arith.constant 0 : index
    %0 = vector.load %arg1[%c0, %c0_0, %c0_1] : memref<1x8x32xf32, #tpu.memory_space<vmem>>, vector<1x8x32xf32>
    %1 = vector.shape_cast %0 : vector<1x8x32xf32> to vector<8x32xf32>
    %c0_2 = arith.constant 0 : index
    %c0_3 = arith.constant 0 : index
    %2 = vector.load %arg2[%c0_2, %c0_3] : memref<32x96xf32, #tpu.memory_space<vmem>>, vector<32x96xf32>
    %cst = arith.constant dense<0.000000e+00> : vector<8x96xf32>
    %3 = tpu.matmul %1, %2, %cst {dimension_numbers = #tpu.dot_dimension_numbers<[1], [0], [0], [1], [0, 0, 1, 1], [], []>} : vector<8x32xf32>, vector<32x96xf32>, vector<8x96xf32> -> vector<8x96xf32>
    %c0_4 = arith.constant 0 : index
    %c0_5 = arith.constant 0 : index
    %4 = vector.load %arg3[%c0_4, %c0_5] : memref<1x96xf32, #tpu.memory_space<vmem>>, vector<1x96xf32>
    %5 = vector.broadcast %4 : vector<1x96xf32> to vector<8x96xf32>
    %6 = arith.addf %3, %5 : vector<8x96xf32>
    %7 = vector.extract_strided_slice %6 {offsets = [0, 0], sizes = [8, 32], strides = [1, 1]} : vector<8x96xf32> to vector<8x32xf32>
    %cst_6 = arith.constant 0.353553385 : f32
    %8 = vector.broadcast %cst_6 : f32 to vector<8x32xf32>
    %9 = arith.mulf %7, %8 : vector<8x32xf32>
    %10 = vector.extract_strided_slice %6 {offsets = [0, 32], sizes = [8, 32], strides = [1, 1]} : vector<8x96xf32> to vector<8x32xf32>
    %11 = vector.extract_strided_slice %6 {offsets = [0, 64], sizes = [8, 32], strides = [1, 1]} : vector<8x96xf32> to vector<8x32xf32>
    %c0_7 = arith.constant 0 : index
    %c0_8 = arith.constant 0 : index
    %12 = vector.load %arg4[%c0_7, %c0_8] : memref<32x32xf32, #tpu.memory_space<vmem>>, vector<32x32xf32>
    %13 = vector.extract_strided_slice %9 {offsets = [0, 0], sizes = [8, 8], strides = [1, 1]} : vector<8x32xf32> to vector<8x8xf32>
    %14 = vector.extract_strided_slice %10 {offsets = [0, 0], sizes = [8, 8], strides = [1, 1]} : vector<8x32xf32> to vector<8x8xf32>
    %15 = vector.extract_strided_slice %11 {offsets = [0, 0], sizes = [8, 8], strides = [1, 1]} : vector<8x32xf32> to vector<8x8xf32>
    %cst_9 = arith.constant dense<0.000000e+00> : vector<8x8xf32>
    %16 = tpu.matmul %13, %14, %cst_9 {dimension_numbers = #tpu.dot_dimension_numbers<[1], [1], [0], [0], [0, 0, 1, 0], [], []>} : vector<8x8xf32>, vector<8x8xf32>, vector<8x8xf32> -> vector<8x8xf32>
    %cst_10 = arith.constant dense<0xFF800000> : vector<8xf32>
    %17 = vector.multi_reduction <maximumf>, %16, %cst_10 [1] : vector<8x8xf32> to vector<8xf32>
    %18 = vector.shape_cast %17 : vector<8xf32> to vector<8x1xf32>
    %19 = vector.broadcast %18 : vector<8x1xf32> to vector<8x8xf32>
    %20 = arith.subf %16, %19 : vector<8x8xf32>
    %21 = math.exp %20 : vector<8x8xf32>
    %cst_11 = arith.constant dense<0.000000e+00> : vector<8xf32>
    %22 = vector.multi_reduction <add>, %21, %cst_11 [1] : vector<8x8xf32> to vector<8xf32>
    %23 = vector.shape_cast %22 : vector<8xf32> to vector<8x1xf32>
    %24 = tpu.reciprocal %23 {approx = true} : vector<8x1xf32> -> vector<8x1xf32>
    %25 = vector.broadcast %24 : vector<8x1xf32> to vector<8x8xf32>
    %26 = arith.mulf %21, %25 : vector<8x8xf32>
    %cst_12 = arith.constant dense<0.000000e+00> : vector<8x8xf32>
    %27 = tpu.matmul %26, %15, %cst_12 {dimension_numbers = #tpu.dot_dimension_numbers<[1], [0], [0], [1], [0, 0, 1, 1], [], []>} : vector<8x8xf32>, vector<8x8xf32>, vector<8x8xf32> -> vector<8x8xf32>
    %28 = vector.extract_strided_slice %12 {offsets = [0, 0], sizes = [8, 32], strides = [1, 1]} : vector<32x32xf32> to vector<8x32xf32>
    %cst_13 = arith.constant dense<0.000000e+00> : vector<8x32xf32>
    %29 = tpu.matmul %27, %28, %cst_13 {dimension_numbers = #tpu.dot_dimension_numbers<[1], [0], [0], [1], [0, 0, 1, 1], [], []>} : vector<8x8xf32>, vector<8x32xf32>, vector<8x32xf32> -> vector<8x32xf32>
    %30 = vector.extract_strided_slice %9 {offsets = [0, 8], sizes = [8, 8], strides = [1, 1]} : vector<8x32xf32> to vector<8x8xf32>
    %31 = vector.extract_strided_slice %10 {offsets = [0, 8], sizes = [8, 8], strides = [1, 1]} : vector<8x32xf32> to vector<8x8xf32>
    %32 = vector.extract_strided_slice %11 {offsets = [0, 8], sizes = [8, 8], strides = [1, 1]} : vector<8x32xf32> to vector<8x8xf32>
    %cst_14 = arith.constant dense<0.000000e+00> : vector<8x8xf32>
    %33 = tpu.matmul %30, %31, %cst_14 {dimension_numbers = #tpu.dot_dimension_numbers<[1], [1], [0], [0], [0, 0, 1, 0], [], []>} : vector<8x8xf32>, vector<8x8xf32>, vector<8x8xf32> -> vector<8x8xf32>
    %cst_15 = arith.constant dense<0xFF800000> : vector<8xf32>
    %34 = vector.multi_reduction <maximumf>, %33, %cst_15 [1] : vector<8x8xf32> to vector<8xf32>
    %35 = vector.shape_cast %34 : vector<8xf32> to vector<8x1xf32>
    %36 = vector.broadcast %35 : vector<8x1xf32> to vector<8x8xf32>
    %37 = arith.subf %33, %36 : vector<8x8xf32>
    %38 = math.exp %37 : vector<8x8xf32>
    %cst_16 = arith.constant dense<0.000000e+00> : vector<8xf32>
    %39 = vector.multi_reduction <add>, %38, %cst_16 [1] : vector<8x8xf32> to vector<8xf32>
    %40 = vector.shape_cast %39 : vector<8xf32> to vector<8x1xf32>
    %41 = tpu.reciprocal %40 {approx = true} : vector<8x1xf32> -> vector<8x1xf32>
    %42 = vector.broadcast %41 : vector<8x1xf32> to vector<8x8xf32>
    %43 = arith.mulf %38, %42 : vector<8x8xf32>
    %cst_17 = arith.constant dense<0.000000e+00> : vector<8x8xf32>
    %44 = tpu.matmul %43, %32, %cst_17 {dimension_numbers = #tpu.dot_dimension_numbers<[1], [0], [0], [1], [0, 0, 1, 1], [], []>} : vector<8x8xf32>, vector<8x8xf32>, vector<8x8xf32> -> vector<8x8xf32>
    %45 = vector.extract_strided_slice %12 {offsets = [8, 0], sizes = [8, 32], strides = [1, 1]} : vector<32x32xf32> to vector<8x32xf32>
    %cst_18 = arith.constant dense<0.000000e+00> : vector<8x32xf32>
    %46 = tpu.matmul %44, %45, %cst_18 {dimension_numbers = #tpu.dot_dimension_numbers<[1], [0], [0], [1], [0, 0, 1, 1], [], []>} : vector<8x8xf32>, vector<8x32xf32>, vector<8x32xf32> -> vector<8x32xf32>
    %47 = arith.addf %29, %46 : vector<8x32xf32>
    %48 = vector.extract_strided_slice %9 {offsets = [0, 16], sizes = [8, 8], strides = [1, 1]} : vector<8x32xf32> to vector<8x8xf32>
    %49 = vector.extract_strided_slice %10 {offsets = [0, 16], sizes = [8, 8], strides = [1, 1]} : vector<8x32xf32> to vector<8x8xf32>
    %50 = vector.extract_strided_slice %11 {offsets = [0, 16], sizes = [8, 8], strides = [1, 1]} : vector<8x32xf32> to vector<8x8xf32>
    %cst_19 = arith.constant dense<0.000000e+00> : vector<8x8xf32>
    %51 = tpu.matmul %48, %49, %cst_19 {dimension_numbers = #tpu.dot_dimension_numbers<[1], [1], [0], [0], [0, 0, 1, 0], [], []>} : vector<8x8xf32>, vector<8x8xf32>, vector<8x8xf32> -> vector<8x8xf32>
    %cst_20 = arith.constant dense<0xFF800000> : vector<8xf32>
    %52 = vector.multi_reduction <maximumf>, %51, %cst_20 [1] : vector<8x8xf32> to vector<8xf32>
    %53 = vector.shape_cast %52 : vector<8xf32> to vector<8x1xf32>
    %54 = vector.broadcast %53 : vector<8x1xf32> to vector<8x8xf32>
    %55 = arith.subf %51, %54 : vector<8x8xf32>
    %56 = math.exp %55 : vector<8x8xf32>
    %cst_21 = arith.constant dense<0.000000e+00> : vector<8xf32>
    %57 = vector.multi_reduction <add>, %56, %cst_21 [1] : vector<8x8xf32> to vector<8xf32>
    %58 = vector.shape_cast %57 : vector<8xf32> to vector<8x1xf32>
    %59 = tpu.reciprocal %58 {approx = true} : vector<8x1xf32> -> vector<8x1xf32>
    %60 = vector.broadcast %59 : vector<8x1xf32> to vector<8x8xf32>
    %61 = arith.mulf %56, %60 : vector<8x8xf32>
    %cst_22 = arith.constant dense<0.000000e+00> : vector<8x8xf32>
    %62 = tpu.matmul %61, %50, %cst_22 {dimension_numbers = #tpu.dot_dimension_numbers<[1], [0], [0], [1], [0, 0, 1, 1], [], []>} : vector<8x8xf32>, vector<8x8xf32>, vector<8x8xf32> -> vector<8x8xf32>
    %63 = vector.extract_strided_slice %12 {offsets = [16, 0], sizes = [8, 32], strides = [1, 1]} : vector<32x32xf32> to vector<8x32xf32>
    %cst_23 = arith.constant dense<0.000000e+00> : vector<8x32xf32>
    %64 = tpu.matmul %62, %63, %cst_23 {dimension_numbers = #tpu.dot_dimension_numbers<[1], [0], [0], [1], [0, 0, 1, 1], [], []>} : vector<8x8xf32>, vector<8x32xf32>, vector<8x32xf32> -> vector<8x32xf32>
    %65 = arith.addf %47, %64 : vector<8x32xf32>
    %66 = vector.extract_strided_slice %9 {offsets = [0, 24], sizes = [8, 8], strides = [1, 1]} : vector<8x32xf32> to vector<8x8xf32>
    %67 = vector.extract_strided_slice %10 {offsets = [0, 24], sizes = [8, 8], strides = [1, 1]} : vector<8x32xf32> to vector<8x8xf32>
    %68 = vector.extract_strided_slice %11 {offsets = [0, 24], sizes = [8, 8], strides = [1, 1]} : vector<8x32xf32> to vector<8x8xf32>
    %cst_24 = arith.constant dense<0.000000e+00> : vector<8x8xf32>
    %69 = tpu.matmul %66, %67, %cst_24 {dimension_numbers = #tpu.dot_dimension_numbers<[1], [1], [0], [0], [0, 0, 1, 0], [], []>} : vector<8x8xf32>, vector<8x8xf32>, vector<8x8xf32> -> vector<8x8xf32>
    %cst_25 = arith.constant dense<0xFF800000> : vector<8xf32>
    %70 = vector.multi_reduction <maximumf>, %69, %cst_25 [1] : vector<8x8xf32> to vector<8xf32>
    %71 = vector.shape_cast %70 : vector<8xf32> to vector<8x1xf32>
    %72 = vector.broadcast %71 : vector<8x1xf32> to vector<8x8xf32>
    %73 = arith.subf %69, %72 : vector<8x8xf32>
    %74 = math.exp %73 : vector<8x8xf32>
    %cst_26 = arith.constant dense<0.000000e+00> : vector<8xf32>
    %75 = vector.multi_reduction <add>, %74, %cst_26 [1] : vector<8x8xf32> to vector<8xf32>
    %76 = vector.shape_cast %75 : vector<8xf32> to vector<8x1xf32>
    %77 = tpu.reciprocal %76 {approx = true} : vector<8x1xf32> -> vector<8x1xf32>
    %78 = vector.broadcast %77 : vector<8x1xf32> to vector<8x8xf32>
    %79 = arith.mulf %74, %78 : vector<8x8xf32>
    %cst_27 = arith.constant dense<0.000000e+00> : vector<8x8xf32>
    %80 = tpu.matmul %79, %68, %cst_27 {dimension_numbers = #tpu.dot_dimension_numbers<[1], [0], [0], [1], [0, 0, 1, 1], [], []>} : vector<8x8xf32>, vector<8x8xf32>, vector<8x8xf32> -> vector<8x8xf32>
    %81 = vector.extract_strided_slice %12 {offsets = [24, 0], sizes = [8, 32], strides = [1, 1]} : vector<32x32xf32> to vector<8x32xf32>
    %cst_28 = arith.constant dense<0.000000e+00> : vector<8x32xf32>
    %82 = tpu.matmul %80, %81, %cst_28 {dimension_numbers = #tpu.dot_dimension_numbers<[1], [0], [0], [1], [0, 0, 1, 1], [], []>} : vector<8x8xf32>, vector<8x32xf32>, vector<8x32xf32> -> vector<8x32xf32>
    %83 = arith.addf %65, %82 : vector<8x32xf32>
    %c0_29 = arith.constant 0 : index
    %c0_30 = arith.constant 0 : index
    %84 = vector.load %arg5[%c0_29, %c0_30] : memref<1x32xf32, #tpu.memory_space<vmem>>, vector<1x32xf32>
    %85 = vector.broadcast %84 : vector<1x32xf32> to vector<8x32xf32>
    %86 = arith.addf %83, %85 : vector<8x32xf32>
    %87 = arith.addf %1, %86 : vector<8x32xf32>
    %c0_31 = arith.constant 0 : index
    %c0_32 = arith.constant 0 : index
    %88 = vector.load %arg10[%c0_31, %c0_32] : memref<1x32xf32, #tpu.memory_space<vmem>>, vector<1x32xf32>
    %c0_33 = arith.constant 0 : index
    %c0_34 = arith.constant 0 : index
    %89 = vector.load %arg11[%c0_33, %c0_34] : memref<1x32xf32, #tpu.memory_space<vmem>>, vector<1x32xf32>
    %cst_35 = arith.constant dense<0.000000e+00> : vector<8xf32>
    %90 = vector.multi_reduction <add>, %87, %cst_35 [1] : vector<8x32xf32> to vector<8xf32>
    %91 = vector.shape_cast %90 : vector<8xf32> to vector<8x1xf32>
    %cst_36 = arith.constant 3.200000e+01 : f32
    %92 = vector.broadcast %cst_36 : f32 to vector<8x1xf32>
    %93 = arith.divf %91, %92 : vector<8x1xf32>
    %94 = vector.broadcast %93 : vector<8x1xf32> to vector<8x32xf32>
    %95 = arith.subf %87, %94 : vector<8x32xf32>
    %96 = arith.mulf %95, %95 : vector<8x32xf32>
    %cst_37 = arith.constant dense<0.000000e+00> : vector<8xf32>
    %97 = vector.multi_reduction <add>, %96, %cst_37 [1] : vector<8x32xf32> to vector<8xf32>
    %98 = vector.shape_cast %97 : vector<8xf32> to vector<8x1xf32>
    %cst_38 = arith.constant 3.200000e+01 : f32
    %99 = vector.broadcast %cst_38 : f32 to vector<8x1xf32>
    %100 = arith.divf %98, %99 : vector<8x1xf32>
    %cst_39 = arith.constant 9.99999997E-7 : f32
    %101 = vector.broadcast %cst_39 : f32 to vector<8x1xf32>
    %102 = arith.addf %100, %101 : vector<8x1xf32>
    %103 = math.rsqrt %102 : vector<8x1xf32>
    %104 = vector.broadcast %103 : vector<8x1xf32> to vector<8x32xf32>
    %105 = arith.mulf %95, %104 : vector<8x32xf32>
    %106 = vector.broadcast %88 : vector<1x32xf32> to vector<8x32xf32>
    %107 = arith.mulf %105, %106 : vector<8x32xf32>
    %108 = vector.broadcast %89 : vector<1x32xf32> to vector<8x32xf32>
    %109 = arith.addf %107, %108 : vector<8x32xf32>
    %c0_40 = arith.constant 0 : index
    %c0_41 = arith.constant 0 : index
    %110 = vector.load %arg6[%c0_40, %c0_41] : memref<32x64xf32, #tpu.memory_space<vmem>>, vector<32x64xf32>
    %cst_42 = arith.constant dense<0.000000e+00> : vector<8x64xf32>
    %111 = tpu.matmul %109, %110, %cst_42 {dimension_numbers = #tpu.dot_dimension_numbers<[1], [0], [0], [1], [0, 0, 1, 1], [], []>} : vector<8x32xf32>, vector<32x64xf32>, vector<8x64xf32> -> vector<8x64xf32>
    %c0_43 = arith.constant 0 : index
    %c0_44 = arith.constant 0 : index
    %112 = vector.load %arg7[%c0_43, %c0_44] : memref<1x64xf32, #tpu.memory_space<vmem>>, vector<1x64xf32>
    %113 = vector.broadcast %112 : vector<1x64xf32> to vector<8x64xf32>
    %114 = arith.addf %111, %113 : vector<8x64xf32>
    %cst_45 = arith.constant 2.000000e+01 : f32
    %115 = vector.broadcast %cst_45 : f32 to vector<8x64xf32>
    %116 = arith.minimumf %114, %115 : vector<8x64xf32>
    %117 = math.exp %116 : vector<8x64xf32>
    %cst_46 = arith.constant 1.000000e+00 : f32
    %118 = vector.broadcast %cst_46 : f32 to vector<8x64xf32>
    %119 = arith.addf %118, %117 : vector<8x64xf32>
    %120 = arith.mulf %119, %119 : vector<8x64xf32>
    %cst_47 = arith.constant 1.000000e+00 : f32
    %121 = vector.broadcast %cst_47 : f32 to vector<8x64xf32>
    %122 = arith.subf %120, %121 : vector<8x64xf32>
    %123 = arith.mulf %114, %122 : vector<8x64xf32>
    %cst_48 = arith.constant 1.000000e+00 : f32
    %124 = vector.broadcast %cst_48 : f32 to vector<8x64xf32>
    %125 = arith.addf %120, %124 : vector<8x64xf32>
    %126 = arith.divf %123, %125 : vector<8x64xf32>
    %c0_49 = arith.constant 0 : index
    %c0_50 = arith.constant 0 : index
    %127 = vector.load %arg8[%c0_49, %c0_50] : memref<64x32xf32, #tpu.memory_space<vmem>>, vector<64x32xf32>
    %cst_51 = arith.constant dense<0.000000e+00> : vector<8x32xf32>
    %128 = tpu.matmul %126, %127, %cst_51 {dimension_numbers = #tpu.dot_dimension_numbers<[1], [0], [0], [1], [0, 0, 1, 1], [], []>} : vector<8x64xf32>, vector<64x32xf32>, vector<8x32xf32> -> vector<8x32xf32>
    %c0_52 = arith.constant 0 : index
    %c0_53 = arith.constant 0 : index
    %129 = vector.load %arg9[%c0_52, %c0_53] : memref<1x32xf32, #tpu.memory_space<vmem>>, vector<1x32xf32>
    %130 = vector.broadcast %129 : vector<1x32xf32> to vector<8x32xf32>
    %131 = arith.addf %128, %130 : vector<8x32xf32>
    %132 = arith.addf %109, %131 : vector<8x32xf32>
    %c0_54 = arith.constant 0 : index
    %c0_55 = arith.constant 0 : index
    %133 = vector.load %arg12[%c0_54, %c0_55] : memref<1x32xf32, #tpu.memory_space<vmem>>, vector<1x32xf32>
    %c0_56 = arith.constant 0 : index
    %c0_57 = arith.constant 0 : index
    %134 = vector.load %arg13[%c0_56, %c0_57] : memref<1x32xf32, #tpu.memory_space<vmem>>, vector<1x32xf32>
    %cst_58 = arith.constant dense<0.000000e+00> : vector<8xf32>
    %135 = vector.multi_reduction <add>, %132, %cst_58 [1] : vector<8x32xf32> to vector<8xf32>
    %136 = vector.shape_cast %135 : vector<8xf32> to vector<8x1xf32>
    %cst_59 = arith.constant 3.200000e+01 : f32
    %137 = vector.broadcast %cst_59 : f32 to vector<8x1xf32>
    %138 = arith.divf %136, %137 : vector<8x1xf32>
    %139 = vector.broadcast %138 : vector<8x1xf32> to vector<8x32xf32>
    %140 = arith.subf %132, %139 : vector<8x32xf32>
    %141 = arith.mulf %140, %140 : vector<8x32xf32>
    %cst_60 = arith.constant dense<0.000000e+00> : vector<8xf32>
    %142 = vector.multi_reduction <add>, %141, %cst_60 [1] : vector<8x32xf32> to vector<8xf32>
    %143 = vector.shape_cast %142 : vector<8xf32> to vector<8x1xf32>
    %cst_61 = arith.constant 3.200000e+01 : f32
    %144 = vector.broadcast %cst_61 : f32 to vector<8x1xf32>
    %145 = arith.divf %143, %144 : vector<8x1xf32>
    %cst_62 = arith.constant 9.99999997E-7 : f32
    %146 = vector.broadcast %cst_62 : f32 to vector<8x1xf32>
    %147 = arith.addf %145, %146 : vector<8x1xf32>
    %148 = math.rsqrt %147 : vector<8x1xf32>
    %149 = vector.broadcast %148 : vector<8x1xf32> to vector<8x32xf32>
    %150 = arith.mulf %140, %149 : vector<8x32xf32>
    %151 = vector.broadcast %133 : vector<1x32xf32> to vector<8x32xf32>
    %152 = arith.mulf %150, %151 : vector<8x32xf32>
    %153 = vector.broadcast %134 : vector<1x32xf32> to vector<8x32xf32>
    %154 = arith.addf %152, %153 : vector<8x32xf32>
    %c0_63 = arith.constant 0 : index
    %c0_64 = arith.constant 0 : index
    %c0_65 = arith.constant 0 : index
    %155 = vector.load %arg14[%c0_63, %c0_64, %c0_65] : memref<1x8x32xf32, #tpu.memory_space<vmem>>, vector<1x8x32xf32>
    %156 = vector.shape_cast %155 : vector<1x8x32xf32> to vector<8x32xf32>
    %157 = vector.shape_cast %154 : vector<8x32xf32> to vector<1x8x32xf32>
    tpu.vector_store %arg14[%c0_63, %c0_64, %c0_65], %157 {strides = array<i32>} : memref<1x8x32xf32, #tpu.memory_space<vmem>>, vector<1x8x32xf32>,
    return
  }
  func.func @transform_0(%arg0: i32) -> (i32, i32, i32) {
    %c0_i32 = arith.constant 0 : i32
    %c0_i32_0 = arith.constant 0 : i32
    %c0_i32_1 = arith.constant 0 : i32
    return %arg0, %c0_i32, %c0_i32_0 : i32, i32, i32
  }
  func.func @transform_1(%arg0: i32) -> (i32, i32) {
    %c0_i32 = arith.constant 0 : i32
    %c0_i32_0 = arith.constant 0 : i32
    %c0_i32_1 = arith.constant 0 : i32
    return %c0_i32, %c0_i32_0 : i32, i32
  }
  func.func @transform_2(%arg0: i32) -> (i32, i32) {
    %c0_i32 = arith.constant 0 : i32
    %c0_i32_0 = arith.constant 0 : i32
    %c0_i32_1 = arith.constant 0 : i32
    return %c0_i32, %c0_i32_0 : i32, i32
  }
  func.func @transform_3(%arg0: i32) -> (i32, i32) {
    %c0_i32 = arith.constant 0 : i32
    %c0_i32_0 = arith.constant 0 : i32
    %c0_i32_1 = arith.constant 0 : i32
    return %c0_i32, %c0_i32_0 : i32, i32
  }
  func.func @transform_4(%arg0: i32) -> (i32, i32) {
    %c0_i32 = arith.constant 0 : i32
    %c0_i32_0 = arith.constant 0 : i32
    %c0_i32_1 = arith.constant 0 : i32
    return %c0_i32, %c0_i32_0 : i32, i32
  }
  func.func @transform_5(%arg0: i32) -> (i32, i32) {
    %c0_i32 = arith.constant 0 : i32
    %c0_i32_0 = arith.constant 0 : i32
    %c0_i32_1 = arith.constant 0 : i32
    return %c0_i32, %c0_i32_0 : i32, i32
  }
  func.func @transform_6(%arg0: i32) -> (i32, i32) {
    %c0_i32 = arith.constant 0 : i32
    %c0_i32_0 = arith.constant 0 : i32
    %c0_i32_1 = arith.constant 0 : i32
    return %c0_i32, %c0_i32_0 : i32, i32
  }
  func.func @transform_7(%arg0: i32) -> (i32, i32) {
    %c0_i32 = arith.constant 0 : i32
    %c0_i32_0 = arith.constant 0 : i32
    %c0_i32_1 = arith.constant 0 : i32
    return %c0_i32, %c0_i32_0 : i32, i32
  }
  func.func @transform_8(%arg0: i32) -> (i32, i32) {
    %c0_i32 = arith.constant 0 : i32
    %c0_i32_0 = arith.constant 0 : i32
    %c0_i32_1 = arith.constant 0 : i32
    return %c0_i32, %c0_i32_0 : i32, i32
  }
  func.func @transform_9(%arg0: i32) -> (i32, i32) {
    %c0_i32 = arith.constant 0 : i32
    %c0_i32_0 = arith.constant 0 : i32
    %c0_i32_1 = arith.constant 0 : i32
    return %c0_i32, %c0_i32_0 : i32, i32
  }
  func.func @transform_10(%arg0: i32) -> (i32, i32) {
    %c0_i32 = arith.constant 0 : i32
    %c0_i32_0 = arith.constant 0 : i32
    %c0_i32_1 = arith.constant 0 : i32
    return %c0_i32, %c0_i32_0 : i32, i32
  }
  func.func @transform_11(%arg0: i32) -> (i32, i32) {
    %c0_i32 = arith.constant 0 : i32
    %c0_i32_0 = arith.constant 0 : i32
    %c0_i32_1 = arith.constant 0 : i32
    return %c0_i32, %c0_i32_0 : i32, i32
  }
  func.func @transform_12(%arg0: i32) -> (i32, i32) {
    %c0_i32 = arith.constant 0 : i32
    %c0_i32_0 = arith.constant 0 : i32
    %c0_i32_1 = arith.constant 0 : i32
    return %c0_i32, %c0_i32_0 : i32, i32
  }
  func.func @transform_13(%arg0: i32) -> (i32, i32, i32) {
    %c0_i32 = arith.constant 0 : i32
    %c0_i32_0 = arith.constant 0 : i32
    %c0_i32_1 = arith.constant 0 : i32
    return %arg0, %c0_i32, %c0_i32_0 : i32, i32, i32
  }
}

module attributes {stable_mosaic.version = 11 : i64} {
  func.func @_encode_layer_kernel(%arg0: i32, %arg1: memref<1x8x32xf32, #tpu.memory_space<vmem>>, %arg2: memref<32x96xf32, #tpu.memory_space<vmem>>, %arg3: memref<1x96xf32, #tpu.memory_space<vmem>>, %arg4: memref<32x32xf32, #tpu.memory_space<vmem>>, %arg5: memref<1x32xf32, #tpu.memory_space<vmem>>, %arg6: memref<32x64xf32, #tpu.memory_space<vmem>>, %arg7: memref<1x64xf32, #tpu.memory_space<vmem>>, %arg8: memref<64x32xf32, #tpu.memory_space<vmem>>, %arg9: memref<1x32xf32, #tpu.memory_space<vmem>>, %arg10: memref<1x32xf32, #tpu.memory_space<vmem>>, %arg11: memref<1x32xf32, #tpu.memory_space<vmem>>, %arg12: memref<1x32xf32, #tpu.memory_space<vmem>>, %arg13: memref<1x32xf32, #tpu.memory_space<vmem>>, %arg14: memref<1x8x32xf32, #tpu.memory_space<vmem>>) attributes {dimension_semantics = [#tpu.dimension_semantics<parallel>], iteration_bounds = array<i64: 2>, scalar_prefetch = 0 : i64, scratch_operands = 0 : i64, tpu.core_type = #tpu.core_type<tc>, window_params = [{transform_indices = @transform_0, window_bounds = array<i64: 1, 8, 32>}, {pipeline_mode = #tpu.pipeline_mode<synchronous>, transform_indices = @transform_1, window_bounds = array<i64: 32, 96>}, {pipeline_mode = #tpu.pipeline_mode<synchronous>, transform_indices = @transform_2, window_bounds = array<i64: 1, 96>}, {pipeline_mode = #tpu.pipeline_mode<synchronous>, transform_indices = @transform_3, window_bounds = array<i64: 32, 32>}, {pipeline_mode = #tpu.pipeline_mode<synchronous>, transform_indices = @transform_4, window_bounds = array<i64: 1, 32>}, {pipeline_mode = #tpu.pipeline_mode<synchronous>, transform_indices = @transform_5, window_bounds = array<i64: 32, 64>}, {pipeline_mode = #tpu.pipeline_mode<synchronous>, transform_indices = @transform_6, window_bounds = array<i64: 1, 64>}, {pipeline_mode = #tpu.pipeline_mode<synchronous>, transform_indices = @transform_7, window_bounds = array<i64: 64, 32>}, {pipeline_mode = #tpu.pipeline_mode<synchronous>, transform_indices = @transform_8, window_bounds = array<i64: 1, 32>}, {pipeline_mode = #tpu.pipeline_mode<synchronous>, transform_indices = @transform_9, window_bounds = array<i64: 1, 32>}, {pipeline_mode = #tpu.pipeline_mode<synchronous>, transform_indices = @transform_10, window_bounds = array<i64: 1, 32>}, {pipeline_mode = #tpu.pipeline_mode<synchronous>, transform_indices = @transform_11, window_bounds = array<i64: 1, 32>}, {pipeline_mode = #tpu.pipeline_mode<synchronous>, transform_indices = @transform_12, window_bounds = array<i64: 1, 32>}, {transform_indices = @transform_13, window_bounds = array<i64: 1, 8, 32>}]} {
    %c0 = arith.constant 0 : index
    %c0_0 = arith.constant 0 : index
    %c0_1 = arith.constant 0 : index
    %0 = vector.load %arg1[%c0, %c0_0, %c0_1] : memref<1x8x32xf32, #tpu.memory_space<vmem>>, vector<1x8x32xf32>
    %1 = vector.shape_cast %0 : vector<1x8x32xf32> to vector<8x32xf32>
    %c0_2 = arith.constant 0 : index
    %c0_3 = arith.constant 0 : index
    %2 = vector.load %arg2[%c0_2, %c0_3] : memref<32x96xf32, #tpu.memory_space<vmem>>, vector<32x96xf32>
    %cst = arith.constant dense<0.000000e+00> : vector<8x96xf32>
    %3 = tpu.matmul %1, %2, %cst {dimension_numbers = #tpu.dot_dimension_numbers<[1], [0], [0], [1], [0, 0, 1, 1], [], []>} : vector<8x32xf32>, vector<32x96xf32>, vector<8x96xf32> -> vector<8x96xf32>
    %c0_4 = arith.constant 0 : index
    %c0_5 = arith.constant 0 : index
    %4 = vector.load %arg3[%c0_4, %c0_5] : memref<1x96xf32, #tpu.memory_space<vmem>>, vector<1x96xf32>
    %5 = vector.broadcast %4 : vector<1x96xf32> to vector<8x96xf32>
    %6 = arith.addf %3, %5 : vector<8x96xf32>
    %7 = vector.extract_strided_slice %6 {offsets = [0, 0], sizes = [8, 32], strides = [1, 1]} : vector<8x96xf32> to vector<8x32xf32>
    %cst_6 = arith.constant 0.353553385 : f32
    %8 = vector.broadcast %cst_6 : f32 to vector<8x32xf32>
    %9 = arith.mulf %7, %8 : vector<8x32xf32>
    %10 = vector.extract_strided_slice %6 {offsets = [0, 32], sizes = [8, 32], strides = [1, 1]} : vector<8x96xf32> to vector<8x32xf32>
    %11 = vector.extract_strided_slice %6 {offsets = [0, 64], sizes = [8, 32], strides = [1, 1]} : vector<8x96xf32> to vector<8x32xf32>
    %c0_7 = arith.constant 0 : index
    %c0_8 = arith.constant 0 : index
    %12 = vector.load %arg4[%c0_7, %c0_8] : memref<32x32xf32, #tpu.memory_space<vmem>>, vector<32x32xf32>
    %13 = vector.extract_strided_slice %9 {offsets = [0, 0], sizes = [8, 8], strides = [1, 1]} : vector<8x32xf32> to vector<8x8xf32>
    %14 = vector.extract_strided_slice %10 {offsets = [0, 0], sizes = [8, 8], strides = [1, 1]} : vector<8x32xf32> to vector<8x8xf32>
    %15 = vector.extract_strided_slice %11 {offsets = [0, 0], sizes = [8, 8], strides = [1, 1]} : vector<8x32xf32> to vector<8x8xf32>
    %cst_9 = arith.constant dense<0.000000e+00> : vector<8x8xf32>
    %16 = tpu.matmul %13, %14, %cst_9 {dimension_numbers = #tpu.dot_dimension_numbers<[1], [1], [0], [0], [0, 0, 1, 0], [], []>} : vector<8x8xf32>, vector<8x8xf32>, vector<8x8xf32> -> vector<8x8xf32>
    %cst_10 = arith.constant dense<0xFF800000> : vector<8xf32>
    %17 = vector.multi_reduction <maximumf>, %16, %cst_10 [1] : vector<8x8xf32> to vector<8xf32>
    %18 = vector.shape_cast %17 : vector<8xf32> to vector<8x1xf32>
    %19 = vector.broadcast %18 : vector<8x1xf32> to vector<8x8xf32>
    %20 = arith.subf %16, %19 : vector<8x8xf32>
    %21 = math.exp %20 : vector<8x8xf32>
    %cst_11 = arith.constant dense<0.000000e+00> : vector<8xf32>
    %22 = vector.multi_reduction <add>, %21, %cst_11 [1] : vector<8x8xf32> to vector<8xf32>
    %23 = vector.shape_cast %22 : vector<8xf32> to vector<8x1xf32>
    %24 = tpu.reciprocal %23 {approx = true} : vector<8x1xf32> -> vector<8x1xf32>
    %25 = vector.broadcast %24 : vector<8x1xf32> to vector<8x8xf32>
    %26 = arith.mulf %21, %25 : vector<8x8xf32>
    %cst_12 = arith.constant dense<0.000000e+00> : vector<8x8xf32>
    %27 = tpu.matmul %26, %15, %cst_12 {dimension_numbers = #tpu.dot_dimension_numbers<[1], [0], [0], [1], [0, 0, 1, 1], [], []>} : vector<8x8xf32>, vector<8x8xf32>, vector<8x8xf32> -> vector<8x8xf32>
    %28 = vector.extract_strided_slice %12 {offsets = [0, 0], sizes = [8, 32], strides = [1, 1]} : vector<32x32xf32> to vector<8x32xf32>
    %cst_13 = arith.constant dense<0.000000e+00> : vector<8x32xf32>
    %29 = tpu.matmul %27, %28, %cst_13 {dimension_numbers = #tpu.dot_dimension_numbers<[1], [0], [0], [1], [0, 0, 1, 1], [], []>} : vector<8x8xf32>, vector<8x32xf32>, vector<8x32xf32> -> vector<8x32xf32>
    %30 = vector.extract_strided_slice %9 {offsets = [0, 8], sizes = [8, 8], strides = [1, 1]} : vector<8x32xf32> to vector<8x8xf32>
    %31 = vector.extract_strided_slice %10 {offsets = [0, 8], sizes = [8, 8], strides = [1, 1]} : vector<8x32xf32> to vector<8x8xf32>
    %32 = vector.extract_strided_slice %11 {offsets = [0, 8], sizes = [8, 8], strides = [1, 1]} : vector<8x32xf32> to vector<8x8xf32>
    %cst_14 = arith.constant dense<0.000000e+00> : vector<8x8xf32>
    %33 = tpu.matmul %30, %31, %cst_14 {dimension_numbers = #tpu.dot_dimension_numbers<[1], [1], [0], [0], [0, 0, 1, 0], [], []>} : vector<8x8xf32>, vector<8x8xf32>, vector<8x8xf32> -> vector<8x8xf32>
    %cst_15 = arith.constant dense<0xFF800000> : vector<8xf32>
    %34 = vector.multi_reduction <maximumf>, %33, %cst_15 [1] : vector<8x8xf32> to vector<8xf32>
    %35 = vector.shape_cast %34 : vector<8xf32> to vector<8x1xf32>
    %36 = vector.broadcast %35 : vector<8x1xf32> to vector<8x8xf32>
    %37 = arith.subf %33, %36 : vector<8x8xf32>
    %38 = math.exp %37 : vector<8x8xf32>
    %cst_16 = arith.constant dense<0.000000e+00> : vector<8xf32>
    %39 = vector.multi_reduction <add>, %38, %cst_16 [1] : vector<8x8xf32> to vector<8xf32>
    %40 = vector.shape_cast %39 : vector<8xf32> to vector<8x1xf32>
    %41 = tpu.reciprocal %40 {approx = true} : vector<8x1xf32> -> vector<8x1xf32>
    %42 = vector.broadcast %41 : vector<8x1xf32> to vector<8x8xf32>
    %43 = arith.mulf %38, %42 : vector<8x8xf32>
    %cst_17 = arith.constant dense<0.000000e+00> : vector<8x8xf32>
    %44 = tpu.matmul %43, %32, %cst_17 {dimension_numbers = #tpu.dot_dimension_numbers<[1], [0], [0], [1], [0, 0, 1, 1], [], []>} : vector<8x8xf32>, vector<8x8xf32>, vector<8x8xf32> -> vector<8x8xf32>
    %45 = vector.extract_strided_slice %12 {offsets = [8, 0], sizes = [8, 32], strides = [1, 1]} : vector<32x32xf32> to vector<8x32xf32>
    %cst_18 = arith.constant dense<0.000000e+00> : vector<8x32xf32>
    %46 = tpu.matmul %44, %45, %cst_18 {dimension_numbers = #tpu.dot_dimension_numbers<[1], [0], [0], [1], [0, 0, 1, 1], [], []>} : vector<8x8xf32>, vector<8x32xf32>, vector<8x32xf32> -> vector<8x32xf32>
    %47 = arith.addf %29, %46 : vector<8x32xf32>
    %48 = vector.extract_strided_slice %9 {offsets = [0, 16], sizes = [8, 8], strides = [1, 1]} : vector<8x32xf32> to vector<8x8xf32>
    %49 = vector.extract_strided_slice %10 {offsets = [0, 16], sizes = [8, 8], strides = [1, 1]} : vector<8x32xf32> to vector<8x8xf32>
    %50 = vector.extract_strided_slice %11 {offsets = [0, 16], sizes = [8, 8], strides = [1, 1]} : vector<8x32xf32> to vector<8x8xf32>
    %cst_19 = arith.constant dense<0.000000e+00> : vector<8x8xf32>
    %51 = tpu.matmul %48, %49, %cst_19 {dimension_numbers = #tpu.dot_dimension_numbers<[1], [1], [0], [0], [0, 0, 1, 0], [], []>} : vector<8x8xf32>, vector<8x8xf32>, vector<8x8xf32> -> vector<8x8xf32>
    %cst_20 = arith.constant dense<0xFF800000> : vector<8xf32>
    %52 = vector.multi_reduction <maximumf>, %51, %cst_20 [1] : vector<8x8xf32> to vector<8xf32>
    %53 = vector.shape_cast %52 : vector<8xf32> to vector<8x1xf32>
    %54 = vector.broadcast %53 : vector<8x1xf32> to vector<8x8xf32>
    %55 = arith.subf %51, %54 : vector<8x8xf32>
    %56 = math.exp %55 : vector<8x8xf32>
    %cst_21 = arith.constant dense<0.000000e+00> : vector<8xf32>
    %57 = vector.multi_reduction <add>, %56, %cst_21 [1] : vector<8x8xf32> to vector<8xf32>
    %58 = vector.shape_cast %57 : vector<8xf32> to vector<8x1xf32>
    %59 = tpu.reciprocal %58 {approx = true} : vector<8x1xf32> -> vector<8x1xf32>
    %60 = vector.broadcast %59 : vector<8x1xf32> to vector<8x8xf32>
    %61 = arith.mulf %56, %60 : vector<8x8xf32>
    %cst_22 = arith.constant dense<0.000000e+00> : vector<8x8xf32>
    %62 = tpu.matmul %61, %50, %cst_22 {dimension_numbers = #tpu.dot_dimension_numbers<[1], [0], [0], [1], [0, 0, 1, 1], [], []>} : vector<8x8xf32>, vector<8x8xf32>, vector<8x8xf32> -> vector<8x8xf32>
    %63 = vector.extract_strided_slice %12 {offsets = [16, 0], sizes = [8, 32], strides = [1, 1]} : vector<32x32xf32> to vector<8x32xf32>
    %cst_23 = arith.constant dense<0.000000e+00> : vector<8x32xf32>
    %64 = tpu.matmul %62, %63, %cst_23 {dimension_numbers = #tpu.dot_dimension_numbers<[1], [0], [0], [1], [0, 0, 1, 1], [], []>} : vector<8x8xf32>, vector<8x32xf32>, vector<8x32xf32> -> vector<8x32xf32>
    %65 = arith.addf %47, %64 : vector<8x32xf32>
    %66 = vector.extract_strided_slice %9 {offsets = [0, 24], sizes = [8, 8], strides = [1, 1]} : vector<8x32xf32> to vector<8x8xf32>
    %67 = vector.extract_strided_slice %10 {offsets = [0, 24], sizes = [8, 8], strides = [1, 1]} : vector<8x32xf32> to vector<8x8xf32>
    %68 = vector.extract_strided_slice %11 {offsets = [0, 24], sizes = [8, 8], strides = [1, 1]} : vector<8x32xf32> to vector<8x8xf32>
    %cst_24 = arith.constant dense<0.000000e+00> : vector<8x8xf32>
    %69 = tpu.matmul %66, %67, %cst_24 {dimension_numbers = #tpu.dot_dimension_numbers<[1], [1], [0], [0], [0, 0, 1, 0], [], []>} : vector<8x8xf32>, vector<8x8xf32>, vector<8x8xf32> -> vector<8x8xf32>
    %cst_25 = arith.constant dense<0xFF800000> : vector<8xf32>
    %70 = vector.multi_reduction <maximumf>, %69, %cst_25 [1] : vector<8x8xf32> to vector<8xf32>
    %71 = vector.shape_cast %70 : vector<8xf32> to vector<8x1xf32>
    %72 = vector.broadcast %71 : vector<8x1xf32> to vector<8x8xf32>
    %73 = arith.subf %69, %72 : vector<8x8xf32>
    %74 = math.exp %73 : vector<8x8xf32>
    %cst_26 = arith.constant dense<0.000000e+00> : vector<8xf32>
    %75 = vector.multi_reduction <add>, %74, %cst_26 [1] : vector<8x8xf32> to vector<8xf32>
    %76 = vector.shape_cast %75 : vector<8xf32> to vector<8x1xf32>
    %77 = tpu.reciprocal %76 {approx = true} : vector<8x1xf32> -> vector<8x1xf32>
    %78 = vector.broadcast %77 : vector<8x1xf32> to vector<8x8xf32>
    %79 = arith.mulf %74, %78 : vector<8x8xf32>
    %cst_27 = arith.constant dense<0.000000e+00> : vector<8x8xf32>
    %80 = tpu.matmul %79, %68, %cst_27 {dimension_numbers = #tpu.dot_dimension_numbers<[1], [0], [0], [1], [0, 0, 1, 1], [], []>} : vector<8x8xf32>, vector<8x8xf32>, vector<8x8xf32> -> vector<8x8xf32>
    %81 = vector.extract_strided_slice %12 {offsets = [24, 0], sizes = [8, 32], strides = [1, 1]} : vector<32x32xf32> to vector<8x32xf32>
    %cst_28 = arith.constant dense<0.000000e+00> : vector<8x32xf32>
    %82 = tpu.matmul %80, %81, %cst_28 {dimension_numbers = #tpu.dot_dimension_numbers<[1], [0], [0], [1], [0, 0, 1, 1], [], []>} : vector<8x8xf32>, vector<8x32xf32>, vector<8x32xf32> -> vector<8x32xf32>
    %83 = arith.addf %65, %82 : vector<8x32xf32>
    %c0_29 = arith.constant 0 : index
    %c0_30 = arith.constant 0 : index
    %84 = vector.load %arg5[%c0_29, %c0_30] : memref<1x32xf32, #tpu.memory_space<vmem>>, vector<1x32xf32>
    %85 = vector.broadcast %84 : vector<1x32xf32> to vector<8x32xf32>
    %86 = arith.addf %83, %85 : vector<8x32xf32>
    %87 = arith.addf %1, %86 : vector<8x32xf32>
    %c0_31 = arith.constant 0 : index
    %c0_32 = arith.constant 0 : index
    %88 = vector.load %arg10[%c0_31, %c0_32] : memref<1x32xf32, #tpu.memory_space<vmem>>, vector<1x32xf32>
    %c0_33 = arith.constant 0 : index
    %c0_34 = arith.constant 0 : index
    %89 = vector.load %arg11[%c0_33, %c0_34] : memref<1x32xf32, #tpu.memory_space<vmem>>, vector<1x32xf32>
    %cst_35 = arith.constant dense<0.000000e+00> : vector<8xf32>
    %90 = vector.multi_reduction <add>, %87, %cst_35 [1] : vector<8x32xf32> to vector<8xf32>
    %91 = vector.shape_cast %90 : vector<8xf32> to vector<8x1xf32>
    %cst_36 = arith.constant 3.200000e+01 : f32
    %92 = vector.broadcast %cst_36 : f32 to vector<8x1xf32>
    %93 = arith.divf %91, %92 : vector<8x1xf32>
    %94 = vector.broadcast %93 : vector<8x1xf32> to vector<8x32xf32>
    %95 = arith.subf %87, %94 : vector<8x32xf32>
    %96 = arith.mulf %95, %95 : vector<8x32xf32>
    %cst_37 = arith.constant dense<0.000000e+00> : vector<8xf32>
    %97 = vector.multi_reduction <add>, %96, %cst_37 [1] : vector<8x32xf32> to vector<8xf32>
    %98 = vector.shape_cast %97 : vector<8xf32> to vector<8x1xf32>
    %cst_38 = arith.constant 3.200000e+01 : f32
    %99 = vector.broadcast %cst_38 : f32 to vector<8x1xf32>
    %100 = arith.divf %98, %99 : vector<8x1xf32>
    %cst_39 = arith.constant 9.99999997E-7 : f32
    %101 = vector.broadcast %cst_39 : f32 to vector<8x1xf32>
    %102 = arith.addf %100, %101 : vector<8x1xf32>
    %103 = math.rsqrt %102 : vector<8x1xf32>
    %104 = vector.broadcast %103 : vector<8x1xf32> to vector<8x32xf32>
    %105 = arith.mulf %95, %104 : vector<8x32xf32>
    %106 = vector.broadcast %88 : vector<1x32xf32> to vector<8x32xf32>
    %107 = arith.mulf %105, %106 : vector<8x32xf32>
    %108 = vector.broadcast %89 : vector<1x32xf32> to vector<8x32xf32>
    %109 = arith.addf %107, %108 : vector<8x32xf32>
    %c0_40 = arith.constant 0 : index
    %c0_41 = arith.constant 0 : index
    %110 = vector.load %arg6[%c0_40, %c0_41] : memref<32x64xf32, #tpu.memory_space<vmem>>, vector<32x64xf32>
    %cst_42 = arith.constant dense<0.000000e+00> : vector<8x64xf32>
    %111 = tpu.matmul %109, %110, %cst_42 {dimension_numbers = #tpu.dot_dimension_numbers<[1], [0], [0], [1], [0, 0, 1, 1], [], []>} : vector<8x32xf32>, vector<32x64xf32>, vector<8x64xf32> -> vector<8x64xf32>
    %c0_43 = arith.constant 0 : index
    %c0_44 = arith.constant 0 : index
    %112 = vector.load %arg7[%c0_43, %c0_44] : memref<1x64xf32, #tpu.memory_space<vmem>>, vector<1x64xf32>
    %113 = vector.broadcast %112 : vector<1x64xf32> to vector<8x64xf32>
    %114 = arith.addf %111, %113 : vector<8x64xf32>
    %cst_45 = arith.constant 2.000000e+01 : f32
    %115 = vector.broadcast %cst_45 : f32 to vector<8x64xf32>
    %116 = arith.minimumf %114, %115 : vector<8x64xf32>
    %117 = math.exp %116 : vector<8x64xf32>
    %cst_46 = arith.constant 1.000000e+00 : f32
    %118 = vector.broadcast %cst_46 : f32 to vector<8x64xf32>
    %119 = arith.addf %118, %117 : vector<8x64xf32>
    %120 = arith.mulf %119, %119 : vector<8x64xf32>
    %cst_47 = arith.constant 1.000000e+00 : f32
    %121 = vector.broadcast %cst_47 : f32 to vector<8x64xf32>
    %122 = arith.subf %120, %121 : vector<8x64xf32>
    %123 = arith.mulf %114, %122 : vector<8x64xf32>
    %cst_48 = arith.constant 1.000000e+00 : f32
    %124 = vector.broadcast %cst_48 : f32 to vector<8x64xf32>
    %125 = arith.addf %120, %124 : vector<8x64xf32>
    %126 = arith.divf %123, %125 : vector<8x64xf32>
    %c0_49 = arith.constant 0 : index
    %c0_50 = arith.constant 0 : index
    %127 = vector.load %arg8[%c0_49, %c0_50] : memref<64x32xf32, #tpu.memory_space<vmem>>, vector<64x32xf32>
    %cst_51 = arith.constant dense<0.000000e+00> : vector<8x32xf32>
    %128 = tpu.matmul %126, %127, %cst_51 {dimension_numbers = #tpu.dot_dimension_numbers<[1], [0], [0], [1], [0, 0, 1, 1], [], []>} : vector<8x64xf32>, vector<64x32xf32>, vector<8x32xf32> -> vector<8x32xf32>
    %c0_52 = arith.constant 0 : index
    %c0_53 = arith.constant 0 : index
    %129 = vector.load %arg9[%c0_52, %c0_53] : memref<1x32xf32, #tpu.memory_space<vmem>>, vector<1x32xf32>
    %130 = vector.broadcast %129 : vector<1x32xf32> to vector<8x32xf32>
    %131 = arith.addf %128, %130 : vector<8x32xf32>
    %132 = arith.addf %109, %131 : vector<8x32xf32>
    %c0_54 = arith.constant 0 : index
    %c0_55 = arith.constant 0 : index
    %133 = vector.load %arg12[%c0_54, %c0_55] : memref<1x32xf32, #tpu.memory_space<vmem>>, vector<1x32xf32>
    %c0_56 = arith.constant 0 : index
    %c0_57 = arith.constant 0 : index
    %134 = vector.load %arg13[%c0_56, %c0_57] : memref<1x32xf32, #tpu.memory_space<vmem>>, vector<1x32xf32>
    %cst_58 = arith.constant dense<0.000000e+00> : vector<8xf32>
    %135 = vector.multi_reduction <add>, %132, %cst_58 [1] : vector<8x32xf32> to vector<8xf32>
    %136 = vector.shape_cast %135 : vector<8xf32> to vector<8x1xf32>
    %cst_59 = arith.constant 3.200000e+01 : f32
    %137 = vector.broadcast %cst_59 : f32 to vector<8x1xf32>
    %138 = arith.divf %136, %137 : vector<8x1xf32>
    %139 = vector.broadcast %138 : vector<8x1xf32> to vector<8x32xf32>
    %140 = arith.subf %132, %139 : vector<8x32xf32>
    %141 = arith.mulf %140, %140 : vector<8x32xf32>
    %cst_60 = arith.constant dense<0.000000e+00> : vector<8xf32>
    %142 = vector.multi_reduction <add>, %141, %cst_60 [1] : vector<8x32xf32> to vector<8xf32>
    %143 = vector.shape_cast %142 : vector<8xf32> to vector<8x1xf32>
    %cst_61 = arith.constant 3.200000e+01 : f32
    %144 = vector.broadcast %cst_61 : f32 to vector<8x1xf32>
    %145 = arith.divf %143, %144 : vector<8x1xf32>
    %cst_62 = arith.constant 9.99999997E-7 : f32
    %146 = vector.broadcast %cst_62 : f32 to vector<8x1xf32>
    %147 = arith.addf %145, %146 : vector<8x1xf32>
    %148 = math.rsqrt %147 : vector<8x1xf32>
    %149 = vector.broadcast %148 : vector<8x1xf32> to vector<8x32xf32>
    %150 = arith.mulf %140, %149 : vector<8x32xf32>
    %151 = vector.broadcast %133 : vector<1x32xf32> to vector<8x32xf32>
    %152 = arith.mulf %150, %151 : vector<8x32xf32>
    %153 = vector.broadcast %134 : vector<1x32xf32> to vector<8x32xf32>
    %154 = arith.addf %152, %153 : vector<8x32xf32>
    %c0_63 = arith.constant 0 : index
    %c0_64 = arith.constant 0 : index
    %c0_65 = arith.constant 0 : index
    %155 = vector.load %arg14[%c0_63, %c0_64, %c0_65] : memref<1x8x32xf32, #tpu.memory_space<vmem>>, vector<1x8x32xf32>
    %156 = vector.shape_cast %155 : vector<1x8x32xf32> to vector<8x32xf32>
    %157 = vector.shape_cast %154 : vector<8x32xf32> to vector<1x8x32xf32>
    tpu.vector_store %arg14[%c0_63, %c0_64, %c0_65], %157 {strides = array<i32>} : memref<1x8x32xf32, #tpu.memory_space<vmem>>, vector<1x8x32xf32>,
    return
  }
  func.func @transform_0(%arg0: i32) -> (i32, i32, i32) {
    %c0_i32 = arith.constant 0 : i32
    %c0_i32_0 = arith.constant 0 : i32
    %c0_i32_1 = arith.constant 0 : i32
    return %arg0, %c0_i32, %c0_i32_0 : i32, i32, i32
  }
  func.func @transform_1(%arg0: i32) -> (i32, i32) {
    %c0_i32 = arith.constant 0 : i32
    %c0_i32_0 = arith.constant 0 : i32
    %c0_i32_1 = arith.constant 0 : i32
    return %c0_i32, %c0_i32_0 : i32, i32
  }
  func.func @transform_2(%arg0: i32) -> (i32, i32) {
    %c0_i32 = arith.constant 0 : i32
    %c0_i32_0 = arith.constant 0 : i32
    %c0_i32_1 = arith.constant 0 : i32
    return %c0_i32, %c0_i32_0 : i32, i32
  }
  func.func @transform_3(%arg0: i32) -> (i32, i32) {
    %c0_i32 = arith.constant 0 : i32
    %c0_i32_0 = arith.constant 0 : i32
    %c0_i32_1 = arith.constant 0 : i32
    return %c0_i32, %c0_i32_0 : i32, i32
  }
  func.func @transform_4(%arg0: i32) -> (i32, i32) {
    %c0_i32 = arith.constant 0 : i32
    %c0_i32_0 = arith.constant 0 : i32
    %c0_i32_1 = arith.constant 0 : i32
    return %c0_i32, %c0_i32_0 : i32, i32
  }
  func.func @transform_5(%arg0: i32) -> (i32, i32) {
    %c0_i32 = arith.constant 0 : i32
    %c0_i32_0 = arith.constant 0 : i32
    %c0_i32_1 = arith.constant 0 : i32
    return %c0_i32, %c0_i32_0 : i32, i32
  }
  func.func @transform_6(%arg0: i32) -> (i32, i32) {
    %c0_i32 = arith.constant 0 : i32
    %c0_i32_0 = arith.constant 0 : i32
    %c0_i32_1 = arith.constant 0 : i32
    return %c0_i32, %c0_i32_0 : i32, i32
  }
  func.func @transform_7(%arg0: i32) -> (i32, i32) {
    %c0_i32 = arith.constant 0 : i32
    %c0_i32_0 = arith.constant 0 : i32
    %c0_i32_1 = arith.constant 0 : i32
    return %c0_i32, %c0_i32_0 : i32, i32
  }
  func.func @transform_8(%arg0: i32) -> (i32, i32) {
    %c0_i32 = arith.constant 0 : i32
    %c0_i32_0 = arith.constant 0 : i32
    %c0_i32_1 = arith.constant 0 : i32
    return %c0_i32, %c0_i32_0 : i32, i32
  }
  func.func @transform_9(%arg0: i32) -> (i32, i32) {
    %c0_i32 = arith.constant 0 : i32
    %c0_i32_0 = arith.constant 0 : i32
    %c0_i32_1 = arith.constant 0 : i32
    return %c0_i32, %c0_i32_0 : i32, i32
  }
  func.func @transform_10(%arg0: i32) -> (i32, i32) {
    %c0_i32 = arith.constant 0 : i32
    %c0_i32_0 = arith.constant 0 : i32
    %c0_i32_1 = arith.constant 0 : i32
    return %c0_i32, %c0_i32_0 : i32, i32
  }
  func.func @transform_11(%arg0: i32) -> (i32, i32) {
    %c0_i32 = arith.constant 0 : i32
    %c0_i32_0 = arith.constant 0 : i32
    %c0_i32_1 = arith.constant 0 : i32
    return %c0_i32, %c0_i32_0 : i32, i32
  }
  func.func @transform_12(%arg0: i32) -> (i32, i32) {
    %c0_i32 = arith.constant 0 : i32
    %c0_i32_0 = arith.constant 0 : i32
    %c0_i32_1 = arith.constant 0 : i32
    return %c0_i32, %c0_i32_0 : i32, i32
  }
  func.func @transform_13(%arg0: i32) -> (i32, i32, i32) {
    %c0_i32 = arith.constant 0 : i32
    %c0_i32_0 = arith.constant 0 : i32
    %c0_i32_1 = arith.constant 0 : i32
    return %arg0, %c0_i32, %c0_i32_0 : i32, i32, i32
  }
}

</mosaic_0001>

<bundles_post_ra>
// kernel: chaotic_encoder_forward.3
= control target key start
LH: loop header
LB: loop body
LE: loop exit
PB: predicated region body
PF: predicated region fallthrough
CT: control target
= control target key end

     0   :  { %s301_s12 = smov 0   ;;  %s327_s0 = inlined_call_operand.vmem [shape: f32[2,8,32], index: 0, kind: input, shape index: {}]   ;;  %s328_s1 = inlined_call_operand.vmem [shape: f32[1,32], index: 1, kind: input, shape index: {}]   ;;  %s329_s2 = inlined_call_operand.vmem [shape: f32[1,32], index: 2, kind: input, shape index: {}]   ;;  %s330_s3 = inlined_call_operand.vmem [shape: f32[2,8,32], index: 3, kind: output, shape index: {}]  }
   0x1 LB: > { %s252_s13 = sadd.s32 4294967295, %s279_s12   ;;  %p256_p0 = scmp.ge.s32.totalorder %s279_s12, 1  ;;  %s279_s12 = sphi %s301_s12, %s13_s12  }
   0x2   : > { %p136_p1 = scmp.lt.s32.totalorder %s279_s12, 3 }
   0x4   : > { %p137_p2 = pnand %p256_p0, %p136_p1 }
   0x5   : > { %p158_p3 = scmp.lt.s32.totalorder (!%p137_p2), %s252_s13, 1  ;;  %vm169_vm0 = vcmask (!%p137_p2), 261120   ;;  %v259_v11 = vld [vmem:[%s328_s1] ss:$0 sm:$0xff] (!%p137_p2) }
   0x6   : > { %140 = sbr.rel (%p137_p2) target bundleno = 331 (0x14b), region = 32  ;;  %v260_v13 = vld [vmem:[%s329_s2] ss:$0 sm:$0xff] (!%p137_p2) }
   0xd   : > { %s332_s13 = smov (!%p158_p3, %s252_s13), 1 }
   0xe   : > { %s257_s14 = sshll.u32 %s332_s13, 3 }
   0xf   : > { %s161_s17 = scalar_lea.vmem %s327_s0, %s257_s14  ;;  %s165_s24 = scalar_lea.vmem %s330_s3, %s257_s14 }
  0x10   : > { %v166_v0 = vld [vmem:[%s161_s17] sm:$0xff] }
  0x11   : > { %v170_v1 = vsel %vm169_vm0, %v166_v0, 0.0 }
  0x12   : > { %171 = vadd.xlane.f32.xlu0 %v170_v1 }
  0x9f   : > { %v172_v2 = vpop.xlane.xlu0 %171 }
  0xa0   : > { %v174_v3 = vmul.f32 0.03125, %v172_v2 }
  0xa2   : > { %v175_v4 = vsub.f32 %v166_v0, %v174_v3 }
  0xa4   : > { %v176_v5 = vmul.f32 %v175_v4, %v175_v4 }
  0xa6   : > { %v177_v6 = vsel %vm169_vm0, %v176_v5, 0.0 }
  0xa7   : > { %178 = vadd.xlane.f32.xlu0 %v177_v6 }
 0x134   : > { %v179_v7 = vpop.xlane.xlu0 %178 }
 0x135   : > { %v180_v8 = vmul.f32 0.03125, %v179_v7 }
 0x137   : > { %v181_v9 = vadd.f32 1e-06, %v180_v8 }
 0x139   : > { %271 = vrsqrt.f32 %v181_v9 }
 0x143   : > { %v272_v10 = vpop.eup %271 }
 0x144   : > { %v183_v12 = vmul.f32 %v272_v10, %v175_v4 }
 0x146   : > { %v190_v14 = vmul.f32 %v259_v11, %v183_v12 }
 0x148   : > { %v197_v15 = vadd.f32 %v260_v13, %v190_v14 }
 0x14a   : > { %198 = vst.msk [vmem:[%s165_s24] sm:$0xff] %vm169_vm0, %v197_v15 }
 0x14b PF: > { %s13_s12 = sadd.s32 1, %s279_s12  }
 0x14c   : > { %p10_p4 = scmp.ge.s32.totalorder %s13_s12, 4  }
 0x14e   :  { %12 = sbr.rel (!%p10_p4) target bundleno = 1 (0x1), region = 62 }

// kernel: chaotic_encoder_forward.5
= control target key start
LH: loop header
LB: loop body
LE: loop exit
PB: predicated region body
PF: predicated region fallthrough
CT: control target
= control target key end

     0   :  { %s2526_s0 = inlined_call_operand.vmem [shape: f32[2,8,32], index: 0, kind: input, shape index: {}]   ;;  %s2527_s1 = inlined_call_operand.vmem [shape: f32[32,96], index: 1, kind: input, shape index: {}]   ;;  %s2528_s2 = inlined_call_operand.vmem [shape: f32[1,96], index: 2, kind: input, shape index: {}]   ;;  %s2529_s3 = inlined_call_operand.vmem [shape: f32[32,32], index: 3, kind: input, shape index: {}]   ;;  %s2530_s4 = inlined_call_operand.vmem [shape: f32[1,32], index: 4, kind: input, shape index: {}]   ;;  %s2531_s5 = inlined_call_operand.vmem [shape: f32[32,64], index: 5, kind: input, shape index: {}]   ;;  %s2532_s6 = inlined_call_operand.vmem [shape: f32[1,64], index: 6, kind: input, shape index: {}]   ;;  %s2533_s7 = inlined_call_operand.vmem [shape: f32[64,32], index: 7, kind: input, shape index: {}]   ;;  %s2534_s8 = inlined_call_operand.vmem [shape: f32[1,32], index: 8, kind: input, shape index: {}]   ;;  %s2535_s9 = inlined_call_operand.vmem [shape: f32[1,32], index: 9, kind: input, shape index: {}]   ;;  %s2536_s10 = inlined_call_operand.vmem [shape: f32[1,32], index: 10, kind: input, shape index: {}]   ;;  %s2537_s11 = inlined_call_operand.vmem [shape: f32[1,32], index: 11, kind: input, shape index: {}]   ;;  %s2538_s12 = inlined_call_operand.vmem [shape: f32[1,32], index: 12, kind: input, shape index: {}]   ;;  %s2539_s13 = inlined_call_operand.hbm [shape: f32[2,8,32], index: 13, kind: output, shape index: {}]  }
   0x1   :  { %2540 = sst [smem:[#allocation5_spill]] %s2526_s0 }
   0x2   :  { %2541 = sst [smem:[#allocation6_spill]] %s2527_s1 }
   0x3   :  { %2542 = sst [smem:[#allocation7_spill]] %s2528_s2 }
   0x4   :  { %2543 = sst [smem:[#allocation8_spill]] %s2529_s3 }
   0x5   :  { %18 = vsyncpa [#allocation3], 0 }
   0x6   :  { %20 = vsyncpa [#allocation3 + $0x1], 0  ;;  %s2240_s25 = smov 0   ;;  %s2242_s26 = smov 0  }
   0x7   :  { %s2244_s27 = smov 0   ;;  %s2246_s28 = smov 0  }
   0x8 LB: > { %s2261_s29 = sadd.s32 4294967295, %s2153_s28   ;;  %s1808_s30 = sadd.s32 4294967294, %s2153_s28   ;;  %s2153_s28 = sphi %s2246_s28, %s2553_s28   ;;  %s2149_s27 = sphi %s2244_s27, %s2552_s27   ;;  %s2145_s26 = sphi %s2242_s26, %s2551_s26   ;;  %s2141_s25 = sphi %s2240_s25, %s2550_s25  }
   0x9   : > { %s2265_s14 = sadd.s32 1, %s2153_s28   ;;  %s311_s15 = sadd.s32 1, %s2149_s27 }
   0xa   : > { %s308_s16 = ssub.s32 %s2153_s28, %s2265_s14  ;;  %p321_p0 = scmp.ne.s32.totalorder %s2149_s27, %s2145_s26 }
   0xb   : > { %p309_p1 = scmp.eq.s32.totalorder %s308_s16, 0  ;;  %p322_p2 = scmp.eq.s32.totalorder %s2261_s29, 1 }
   0xc   : > { %p327_p3 = scmp.ne.s32.totalorder %s2145_s26, %s2141_s25  ;;  %p328_p4 = scmp.eq.s32.totalorder %s1808_s30, 1 }
   0xd   : > { %s2276_s17 = scalar_select %p309_p1, %s2149_s27, %s311_s15  }
   0xe   : > { %p2278_p5 = por %p322_p2, %p321_p0  ;;  %p2282_p6 = por %p328_p4, %p327_p3 }
   0xf   : > { %p1811_p7 = scmp.ge.s32.totalorder %s2153_s28, 1  ;;  %p389_p8 = scmp.lt.s32.totalorder %s2153_s28, 3 }
  0x11   : > { %p390_p9 = pnand %p1811_p7, %p389_p8 }
  0x12   : > { %s2546_s1 = sld [smem:[#allocation6_spill]] (!%p390_p9)  ;;  %v2155_v3 = vmov (!%p390_p9), 0.0|0.0   ;;  %vm2156_vm0 = vmmov (!%p390_p9), 0   ;;  %v2157_v6 = vmov (!%p390_p9), 0.0   ;;  %p432_p10 = scmp.lt.s32.totalorder (!%p390_p9), %s2261_s29, 1  ;;  %vm448_vm1 = vcmask (!%p390_p9), 261120  }
  0x13   : > { %393 = sbr.rel (%p390_p9) target bundleno = 3702 (0xe76), region = 72  ;;  %1990 = vmatprep.subr.bf16.mxu0 (!%p390_p9), %v2155_v3  ;;  %1897 = vmatprep.mubr.msk.f32.mxu0 (!%p390_p9), %vm2156_vm0, %v2157_v6  ;;  %s2547_s0 = sld [smem:[#allocation5_spill]] (!%p390_p9)  ;;  %vm530_vm2 = vcmask (!%p390_p9), 64512   ;;  %vm1630_vm3 = vcmask (!%p390_p9), 523264  }
  0x14   : > { %1905 = vmatprep.subr.mxu1 (!%p390_p9), %v2157_v6  ;;  %1907 = vmatprep.mubr.msk.f32.mxu1 (!%p390_p9), %vm2156_vm0, %v2157_v6  ;;  %s2548_s2 = sld [smem:[#allocation7_spill]] (!%p390_p9)  ;;  %s2158_s16 = smov (!%p390_p9), 96  }
  0x15   : > { %s2161_s22 = smov (!%p390_p9), 56   ;;  %s2162_s23 = smov (!%p390_p9), 64  }
  0x16   : > { %s2164_s30 = smov (!%p390_p9), 112   ;;  %s2549_s3 = sld [smem:[#allocation8_spill]] (!%p390_p9) }
  0x18   : > { %v437_v0 = vld [vmem:[%s2546_s1] sm:$0xff] (!%p390_p9)  ;;  %v438_v1 = vld [vmem:[%s2546_s1 + $0x8] sm:$0xff] (!%p390_p9)  ;;  %v439_v2 = vld [vmem:[%s2546_s1 + $0x10] sm:$0xff] (!%p390_p9) }
  0x19   : > { %v1991_v4 = vpack.c.bf16 (!%p390_p9), %v438_v1, %v437_v0  ;;  %v440_v5 = vld [vmem:[%s2546_s1 + $0x18] sm:$0xff] (!%p390_p9) }
  0x1a   : > { %v1994_v7 = vpack.c.bf16 %v440_v5, %v439_v2  ;;  %s433_s20 = scalar_select %p432_p10, %s2261_s29, 1  ;;  %v1814_v9 = vld [vmem:[%s2548_s2] ss:$0 sm:$0xff] }
  0x1b   : > { %1992 = vmatpush3.bf16.msra.mxu0 %v1991_v4 }
  0x1c   : > { %1993 = vmatprep.subr.bf16.mxu0 %v2155_v3  ;;  %s1813_s21 = sshll.u32 %s433_s20, 3  ;;  %s2159_s20 = smov 120   ;;  %v524_v33 = vld [vmem:[%s2549_s3 + $0x8] sm:$0xff]  ;;  %v523_v42 = vld [vmem:[%s2549_s3] sm:$0xff]  ;;  %v525_v5 = vld [vmem:[%s2549_s3 + $0x10] sm:$0xff] }
  0x1d   : > { %s435_s24 = scalar_lea.vmem %s2547_s0, %s1813_s21  ;;  %s2160_s21 = smov 88  }
  0x1e   : > { %v2312_v8 = vld [vmem:[%s435_s24] sm:$0xff]  ;;  %s2163_s24 = smov 80  }
  0x1f   : > { %1995 = vmatpush3.bf16.msra.mxu0 %v1994_v7 }
  0x20   : > { %1900 = vmatprep.subr.mxu0 %v2157_v6 }
  0x22   : > { %1898 = vmatmul.mubr.msk.f32.vlgmr.msra.gmra.mrb[0].mxu0 %vm448_vm1, %v2312_v8 }
  0x23   : > { %1902 = vmatprep.mubr.msk.f32.mxu0 %vm2156_vm0, %v2157_v6 }
  0xf5   : > { %v518_v10 = vpop.f32.mrb[0].mxu0 }
  0xf6   : > { %v2322_v11 = vadd.f32 %v1814_v9, %v518_v10  ;;  %v1899_v12 = vpop.f32.mrb[1].mxu0 }
  0xf8   : > { %528 = vrot.lane.b32.xlu0 %v2322_v11, %s2158_s16  ;;  %v2326_v13 = vmul.f32 0.35355338, %v2322_v11  ;;  %s2168_s16 = smov 40  }
  0xfa   : > { %693 = vrot.lane.b32.xlu1 %v2326_v13, %s2159_s20 }
  0xfc   : > { %695 = vrot.lane.b32.xlu0 %v2322_v11, %s2160_s21 }
 0x16a   : > { %v529_v14 = vpop.permute.xlu0 %528 }
 0x16b   : > { %1901 = vmatpush3.xpose.msk.msra.mxu0 %vm530_vm2, %v529_v14 }
 0x16c   : > { %1910 = vmatprep.subr.mxu0 %v2157_v6  ;;  %v694_v16 = vpop.permute.xlu1 %693 }
 0x16e   : > { %v696_v15 = vpop.permute.xlu0 %695  ;;  %1903 = vmatmul.mubr.msk.f32.vlgmr.msra.gmra.mrb[2].mxu0 %vm530_vm2, %v2326_v13 }
 0x16f   : > { %1911 = vmatpush3.xpose.msk.msra.mxu0 %vm530_vm2, %v696_v15  ;;  %1912 = vmatprep.mubr.msk.f32.mxu0 %vm2156_vm0, %v2157_v6 }
 0x170   : > { %1920 = vmatprep.subr.mxu0 %v2157_v6 }
 0x172   : > { %1913 = vmatmul.mubr.msk.f32.vlgmr.msra.gmra.mrb[4].mxu0 %vm530_vm2, %v694_v16 }
 0x173   : > { %1922 = vmatprep.mubr.msk.f32.mxu0 %vm2156_vm0, %v2157_v6  ;;  %1921 = vmatpush3.msra.mxu0 %v524_v33 }
 0x174   : > { %1930 = vmatprep.subr.mxu0 %v2157_v6 }
 0x241   : > { %v602_v17 = vpop.f32.mrb[2].mxu0 }
 0x242   : > { %v1904_v18 = vpop.f32.mrb[3].mxu0  ;;  %v606_v19 = vsel %vm530_vm2, %v602_v17, -inf }
 0x243   : > { %607 = vmax.xlane.f32.xlu1 %v606_v19 }
 0x245   : > { %v767_v20 = vpop.f32.mrb[4].mxu0 }
 0x246   : > { %v1914_v21 = vpop.f32.mrb[5].mxu0  ;;  %v771_v22 = vsel %vm530_vm2, %v767_v20, -inf }
 0x247   : > { %772 = vmax.xlane.f32.xlu0 %v771_v22 }
 0x2d0   : > { %v608_v23 = vpop.xlane.xlu1 %607 }
 0x2d1   : > { %v609_v24 = vsub.f32 %v602_v17, %v608_v23 }
 0x2d3   : > { %v610_v25 = vmul.f32 1.442695, %v609_v24 }
 0x2d4   : > { %v773_v26 = vpop.xlane.xlu0 %772 }
 0x2d5   : > { %2067 = vpow2.f32 %v610_v25  ;;  %v774_v27 = vsub.f32 %v767_v20, %v773_v26  ;;  %v526_v20 = vld [vmem:[%s2549_s3 + $0x18] sm:$0xff] }
 0x2d7   : > { %v775_v28 = vmul.f32 1.442695, %v774_v27 }
 0x2d9   : > { %2069 = vpow2.f32 %v775_v28 }
 0x2df   : > { %v2068_v29 = vpop.eup %2067 }
 0x2e0   : > { %v612_v30 = vsel %vm530_vm2, %v2068_v29, 0.0 }
 0x2e1   : > { %613 = vadd.xlane.f32.xlu0 %v612_v30 }
 0x2e3   : > { %v2070_v31 = vpop.eup %2069 }
 0x2e4   : > { %v777_v32 = vsel %vm530_vm2, %v2070_v31, 0.0 }
 0x2e5   : > { %778 = vadd.xlane.f32.xlu1 %v777_v32 }
 0x2f6   : > { %782 = vrot.lane.b32.xlu1 %v2322_v11, %s2161_s22  ;;  %s2165_s22 = smov 72  }
 0x2f7   : > { %617 = vrot.lane.b32.xlu0 %v2322_v11, %s2162_s23  ;;  %s2166_s23 = smov 104  }
 0x2fa   : > { %1006 = vrot.lane.b32.xlu1 %v2322_v11, %s2163_s24  ;;  %s2167_s24 = smov 48  }
 0x2fb   : > { %1004 = vrot.lane.b32.xlu0 %v2326_v13, %s2164_s30 }
 0x36e   : > { %v614_v34 = vpop.xlane.xlu0 %613 }
 0x36f   : > { %2071 = vrcp.f32 %v614_v34 }
 0x372   : > { %v779_v35 = vpop.xlane.xlu1 %778  ;;  %v618_v36 = vpop.permute.xlu0 %617 }
 0x373   : > { %2073 = vrcp.f32 %v779_v35  ;;  %1906 = vmatpush3.msra.mxu1 %v618_v36 }
 0x374   : > { %1915 = vmatprep.subr.mxu1 %v2157_v6 }
 0x376   : > { %v783_v39 = vpop.permute.xlu1 %782  ;;  %v1005_v48 = vpop.permute.xlu0 %1004 }
 0x379   : > { %v2072_v37 = vpop.eup %2071 }
 0x37a   : > { %v616_v38 = vmul.f32 %v2072_v37, %v2068_v29  ;;  %v1007_v46 = vpop.permute.xlu1 %1006  ;;  %v1832_v29 = vld [vmem:[%s2530_s4] ss:$0 sm:$0xff] }
 0x37c   : > { %1908 = vmatmul.mubr.msk.f32.vlgmr.msra.gmra.mrb[0].mxu1 %vm530_vm2, %v616_v38 }
 0x37d   : > { %v2074_v40 = vpop.eup %2073  ;;  %1916 = vmatpush3.msra.mxu1 %v783_v39  ;;  %1917 = vmatprep.mubr.msk.f32.mxu1 %vm2156_vm0, %v2157_v6 }
 0x37e   : > { %v781_v41 = vmul.f32 %v2074_v40, %v2070_v31  ;;  %1925 = vmatprep.subr.mxu1 %v2157_v6  ;;  %v1522_v40 = vld [vmem:[%s2531_s5 + $0x8] sm:$0xff] }
 0x380   : > { %1918 = vmatmul.mubr.msk.f32.vlgmr.msra.gmra.mrb[2].mxu1 %vm530_vm2, %v781_v41 }
 0x381   : > { %1927 = vmatprep.mubr.msk.f32.mxu1 %vm2156_vm0, %v2157_v6  ;;  %1926 = vmatpush3.msra.mxu1 %v523_v42  ;;  %v1524_v42 = vld [vmem:[%s2531_s5 + $0x18] sm:$0xff] }
 0x382   : > { %1935 = vmatprep.subr.mxu1 %v2157_v6 }
 0x44f   : > { %v689_v43 = vpop.f32.mrb[0].mxu1 }
 0x450   : > { %v1909_v44 = vpop.f32.mrb[1].mxu1  ;;  %1928 = vmatmul.mubr.msk.f32.vlgmr.msra.gmra.mrb[4].mxu1 %vm530_vm2, %v689_v43 }
 0x451   : > { %1937 = vmatprep.mubr.msk.f32.mxu1 %vm2156_vm0, %v2157_v6 }
 0x453   : > { %v854_v45 = vpop.f32.mrb[2].mxu1 }
 0x454   : > { %v1919_v47 = vpop.f32.mrb[3].mxu1  ;;  %1923 = vmatmul.mubr.msk.f32.vlgmr.msra.gmra.mrb[6].mxu0 %vm530_vm2, %v854_v45 }
 0x455   : > { %1931 = vmatpush3.xpose.msk.msra.mxu0 %vm530_vm2, %v1007_v46  ;;  %1932 = vmatprep.mubr.msk.f32.mxu0 %vm2156_vm0, %v2157_v6 }
 0x456   : > { %1940 = vmatprep.subr.mxu0 %v2157_v6 }
 0x458   : > { %1933 = vmatmul.mubr.msk.f32.vlgmr.msra.gmra.mrb[8].mxu0 %vm530_vm2, %v1005_v48  ;;  %v1833_v48 = vld [vmem:[%s2535_s9] ss:$0 sm:$0xff] }
 0x459   : > { %1942 = vmatprep.mubr.msk.f32.mxu0 %vm2156_vm0, %v2157_v6  ;;  %1941 = vmatpush3.msra.mxu0 %v525_v5 }
 0x45a   : > { %1950 = vmatprep.subr.mxu0 %v2157_v6 }
 0x523   : > { %v1000_v49 = vpop.f32.mrb[4].mxu1 }
 0x524   : > { %v1929_v50 = vpop.f32.mrb[5].mxu1 }
 0x525   : > { %v1834_v50 = vld [vmem:[%s2536_s10] ss:$0 sm:$0xff] }
 0x527   : > { %v927_v51 = vpop.f32.mrb[6].mxu0 }
 0x528   : > { %v1001_v52 = vadd.f32 %v1000_v49, %v927_v51  ;;  %v1924_v53 = vpop.f32.mrb[7].mxu0 }
 0x529   : > { %v1615_v53 = vld [vmem:[%s2533_s7] sm:$0xff] }
 0x52b   : > { %v1078_v54 = vpop.f32.mrb[8].mxu0 }
 0x52c   : > { %v1934_v55 = vpop.f32.mrb[9].mxu0  ;;  %v1082_v56 = vsel %vm530_vm2, %v1078_v54, -inf }
 0x52d   : > { %1083 = vmax.xlane.f32.xlu1 %v1082_v56  ;;  %v1617_v56 = vld [vmem:[%s2533_s7 + $0x10] sm:$0xff] }
 0x53e   : > { %1245 = vrot.lane.b32.xlu1 %v2322_v11, %s2165_s22  ;;  %s1843_s22 = sshll.u32 %s2261_s29, 7  ;;  %s2169_s29 = smov [#allocation2]  }
 0x53f   : > { %s2483_s3 = scalar_lea.hbm %s2539_s13, %s1843_s22 }
 0x542   : > { %1243 = vrot.lane.b32.xlu1 %v2326_v13, %s2166_s23 }
 0x5ba   : > { %v1084_v57 = vpop.xlane.xlu1 %1083 }
 0x5bb   : > { %v1085_v58 = vsub.f32 %v1078_v54, %v1084_v57  ;;  %v1616_v54 = vld [vmem:[%s2533_s7 + $0x8] sm:$0xff]  ;;  %v1618_v57 = vld [vmem:[%s2533_s7 + $0x18] sm:$0xff] }
 0x5bc   : > { %v2003_v55 = vpack.c.bf16 %v1616_v54, %v1615_v53 }
 0x5bd   : > { %v1086_v59 = vmul.f32 1.442695, %v1085_v58  ;;  %v2006_v58 = vpack.c.bf16 %v1618_v57, %v1617_v56 }
 0x5be   : > { %v1246_v1 = vpop.permute.xlu1 %1245 }
 0x5bf   : > { %2075 = vpow2.f32 %v1086_v59  ;;  %v1619_v59 = vld [vmem:[%s2533_s7 + $0x20] sm:$0xff] }
 0x5c2   : > { %v1244_v4 = vpop.permute.xlu1 %1243 }
 0x5c9   : > { %v2076_v60 = vpop.eup %2075 }
 0x5ca   : > { %v1088_v61 = vsel %vm530_vm2, %v2076_v60, 0.0 }
 0x5cb   : > { %1089 = vadd.xlane.f32.xlu0 %v1088_v61 }
 0x5e1   : > { %1093 = vrot.lane.b32.xlu0 %v2322_v11, %s2167_s24  ;;  %s429_s24 = sand.u32 1, %s2145_s26  }
 0x5e2   : > { %s1812_s30 = sshll.u32 %s429_s24, 3  ;;  %s1736_s15 = scalar_lea.sflag [#allocation3], %s429_s24 }
 0x5e3   : > { %s431_s23 = scalar_lea.vmem [#allocation2], %s1812_s30  ;;  %s2095_s30 = sshll.u32 %s2169_s29, 4  ;;  %s2096_s30 = int_to_ptr.vmem [resolvable:$false] %s2095_s30 }
 0x5e4   : > { %s1749_s0 = sshll.u32 %s431_s23, 4  ;;  %s2097_s20 = scalar_lea.vmem %s2096_s30, 256  ;;  %s2485_s0 = int_to_ptr.vmem [resolvable:$true] %s1749_s0 }
 0x5e5   : > { %p2098_p0 = scmp.lt.s32.totalorder %s2485_s0, %s2096_s30 }
 0x658   : > { %v1090_v62 = vpop.xlane.xlu0 %1089 }
 0x659   : > { %2077 = vrcp.f32 %v1090_v62  ;;  %v1621_v62 = vld [vmem:[%s2533_s7 + $0x30] sm:$0xff] }
 0x65c   : > { %v1094_v63 = vpop.permute.xlu0 %1093 }
 0x65d   : > { %1936 = vmatpush3.msra.mxu1 %v1094_v63  ;;  %v1622_v63 = vld [vmem:[%s2533_s7 + $0x38] sm:$0xff] }
 0x65e   : > { %1945 = vmatprep.subr.mxu1 %v2157_v6 }
 0x663   : > { %v2078_v0 = vpop.eup %2077 }
 0x664   : > { %v1092_v2 = vmul.f32 %v2078_v0, %v2076_v60  ;;  %v1620_v60 = vld [vmem:[%s2533_s7 + $0x28] sm:$0xff]  ;;  %v2012_v0 = vpack.c.bf16 %v1622_v63, %v1621_v62 }
 0x665   : > { %v2009_v61 = vpack.c.bf16 %v1620_v60, %v1619_v59 }
 0x666   : > { %1938 = vmatmul.mubr.msk.f32.vlgmr.msra.gmra.mrb[6].mxu1 %vm530_vm2, %v1092_v2 }
 0x667   : > { %1946 = vmatpush3.xpose.msk.msra.mxu1 %vm530_vm2, %v1246_v1  ;;  %1947 = vmatprep.mubr.msk.f32.mxu1 %vm2156_vm0, %v2157_v6  ;;  %v1835_v1 = vld [vmem:[%s2532_s6] ss:$0 sm:$0xff] }
 0x668   : > { %1955 = vmatprep.subr.mxu1 %v2157_v6 }
 0x66a   : > { %1948 = vmatmul.mubr.msk.f32.vlgmr.msra.gmra.mrb[8].mxu1 %vm530_vm2, %v1244_v4 }
 0x66b   : > { %1957 = vmatprep.mubr.msk.f32.mxu1 %vm2156_vm0, %v2157_v6  ;;  %1956 = vmatpush3.msra.mxu1 %v526_v20 }
 0x66c   : > { %2002 = vmatprep.subr.bf16.mxu1 %v2155_v3 }
 0x739   : > { %v1165_v7 = vpop.f32.mrb[6].mxu1 }
 0x73a   : > { %v1939_v9 = vpop.f32.mrb[7].mxu1  ;;  %1943 = vmatmul.mubr.msk.f32.vlgmr.msra.gmra.mrb[10].mxu0 %vm530_vm2, %v1165_v7 }
 0x73b   : > { %1952 = vmatprep.mubr.msk.f32.mxu0 %vm2156_vm0, %v2157_v6 }
 0x73d   : > { %v1317_v10 = vpop.f32.mrb[8].mxu1 }
 0x73e   : > { %v1949_v12 = vpop.f32.mrb[9].mxu1  ;;  %v1321_v13 = vsel %vm530_vm2, %v1317_v10, -inf }
 0x73f   : > { %1322 = vmax.xlane.f32.xlu0 %v1321_v13 }
 0x755   : > { %1332 = vrot.lane.b32.xlu0 %v2322_v11, %s2168_s16  ;;  %s2091_s16 = scalar_lea.vmem %s2485_s0, 128 }
 0x756   : > { %p2092_p11 = scmp.ne.s32.totalorder %s2485_s0, %s2091_s16  ;;  %p2099_p1 = scmp.lt.s32.totalorder %s2097_s20, %s2091_s16 }
 0x758   : > { %p2093_p12 = pnand %p2092_p11, %p2278_p5  ;;  %p2100_p2 = por %p2099_p1, %p2098_p0 }
 0x75a   : > { %p2094_p13 = pneg %p2093_p12 }
 0x75c   : > { %p2101_p3 = pnand %p2100_p2, %p2094_p13 }
 0x7cc   : > { %v1323_v14 = vpop.xlane.xlu0 %1322 }
 0x7cd   : > { %v1324_v15 = vsub.f32 %v1317_v10, %v1323_v14 }
 0x7cf   : > { %v1325_v16 = vmul.f32 1.442695, %v1324_v15 }
 0x7d0   : > { %v1333_v17 = vpop.permute.xlu0 %1332 }
 0x7d1   : > { %2079 = vpow2.f32 %v1325_v16  ;;  %1951 = vmatpush3.msra.mxu0 %v1333_v17 }
 0x7d2   : > { %1996 = vmatprep.subr.bf16.mxu0 %v2155_v3 }
 0x7db   : > { %v2080_v18 = vpop.eup %2079 }
 0x7dc   : > { %v1327_v19 = vsel %vm530_vm2, %v2080_v18, 0.0 }
 0x7dd   : > { %1328 = vadd.xlane.f32.xlu1 %v1327_v19 }
 0x80d   : > { %v1238_v11 = vpop.f32.mrb[10].mxu0 }
 0x80e   : > { %v1242_v21 = vadd.f32 %v1238_v11, %v1001_v52  ;;  %v1944_v22 = vpop.f32.mrb[11].mxu0 }
 0x86a   : > { %v1329_v23 = vpop.xlane.xlu1 %1328 }
 0x86b   : > { %2081 = vrcp.f32 %v1329_v23 }
 0x875   : > { %v2082_v24 = vpop.eup %2081 }
 0x876   : > { %v1331_v25 = vmul.f32 %v2082_v24, %v2080_v18  ;;  %v1838_v18 = vld [vmem:[%s2534_s8] ss:$0 sm:$0xff] }
 0x878   : > { %1953 = vmatmul.mubr.msk.f32.vlgmr.msra.gmra.mrb[12].mxu0 %vm530_vm2, %v1331_v25 }
 0x879   : > { %1968 = vmatprep.mubr.msk.f32.mxu0 %vm2156_vm0, %v2157_v6 }
 0x94b   : > { %v1404_v26 = vpop.f32.mrb[12].mxu0 }
 0x94c   : > { %v1954_v27 = vpop.f32.mrb[13].mxu0  ;;  %1958 = vmatmul.mubr.msk.f32.vlgmr.msra.gmra.mrb[10].mxu1 %vm530_vm2, %v1404_v26 }
 0x94d   : > { %1987 = vmatprep.mubr.msk.f32.mxu1 %vm2156_vm0, %v2157_v6  ;;  %v1521_v6 = vld [vmem:[%s2531_s5] sm:$0xff]  ;;  %2004 = vmatpush3.bf16.msra.mxu1 %v2003_v55 }
 0x94e   : > { %v1997_v41 = vpack.c.bf16 %v1522_v40, %v1521_v6  ;;  %2005 = vmatprep.subr.bf16.mxu1 %v2155_v3 }
 0x950   : > { %1998 = vmatpush3.bf16.msra.mxu0 %v1997_v41 }
 0x951   : > { %1999 = vmatprep.subr.bf16.mxu0 %v2155_v3  ;;  %2007 = vmatpush3.bf16.msra.mxu1 %v2006_v58 }
 0x952   : > { %2008 = vmatprep.subr.bf16.mxu1 %v2155_v3 }
 0x955   : > { %2010 = vmatpush3.bf16.msra.mxu1 %v2009_v61 }
 0x956   : > { %2011 = vmatprep.subr.bf16.mxu1 %v2155_v3 }
 0x959   : > { %2013 = vmatpush3.bf16.msra.mxu1 %v2012_v0 }
 0xa1f   : > { %v1477_v28 = vpop.f32.mrb[10].mxu1 }
 0xa20   : > { %v1481_v30 = vadd.f32 %v1477_v28, %v1242_v21  ;;  %v1959_v31 = vpop.f32.mrb[11].mxu1 }
 0xa22   : > { %v1489_v32 = vadd.f32 %v1832_v29, %v1481_v30 }
 0xa24   : > { %v1490_v33 = vadd.f32 %v1489_v32, %v2312_v8  ;;  %v1523_v8 = vld [vmem:[%s2531_s5 + $0x10] sm:$0xff]  ;;  %v1840_v32 = vld [vmem:[%s2537_s11] ss:$0 sm:$0xff] }
 0xa25   : > { %v2000_v43 = vpack.c.bf16 %v1524_v42, %v1523_v8 }
 0xa26   : > { %v1493_v34 = vsel %vm448_vm1, %v1490_v33, 0.0 }
 0xa27   : > { %1494 = vadd.xlane.f32.xlu1 %v1493_v34  ;;  %2001 = vmatpush3.bf16.msra.mxu0 %v2000_v43  ;;  %v1841_v34 = vld [vmem:[%s2538_s12] ss:$0 sm:$0xff] }
 0xab4   : > { %v1495_v35 = vpop.xlane.xlu1 %1494 }
 0xab5   : > { %v1497_v36 = vmul.f32 0.03125, %v1495_v35 }
 0xab7   : > { %v1498_v37 = vsub.f32 %v1490_v33, %v1497_v36 }
 0xab9   : > { %v1499_v38 = vmul.f32 %v1498_v37, %v1498_v37 }
 0xabb   : > { %v1500_v39 = vsel %vm448_vm1, %v1499_v38, 0.0 }
 0xabc   : > { %1501 = vadd.xlane.f32.xlu1 %v1500_v39 }
 0xb49   : > { %v1502_v44 = vpop.xlane.xlu1 %1501 }
 0xb4a   : > { %v1503_v45 = vmul.f32 0.03125, %v1502_v44 }
 0xb4c   : > { %v1504_v46 = vadd.f32 1e-06, %v1503_v45 }
 0xb4e   : > { %2083 = vrsqrt.f32 %v1504_v46 }
 0xb58   : > { %v2084_v47 = vpop.eup %2083 }
 0xb59   : > { %v1506_v49 = vmul.f32 %v2084_v47, %v1498_v37 }
 0xb5b   : > { %v1513_v51 = vmul.f32 %v1833_v48, %v1506_v49 }
 0xb5d   : > { %v1520_v52 = vadd.f32 %v1834_v50, %v1513_v51 }
 0xb5f   : > { %1969 = vmatmul.mubr.msk.f32.vlgmr.msra.gmra.mrb[14].mxu0 %vm448_vm1, %v1520_v52 }
 0xc32   : > { %v1601_v2 = vpop.f32.mrb[14].mxu0 }
 0xc33   : > { %v1602_v4 = vadd.f32 %v1835_v1, %v1601_v2  ;;  %v1970_v5 = vpop.f32.mrb[15].mxu0 }
 0xc35   : > { %v1605_v7 = vmin.f32 %v1602_v4, 20.0 }
 0xc37   : > { %v1606_v9 = vmul.f32 1.442695, %v1605_v7 }
 0xc39   : > { %2085 = vpow2.f32 %v1606_v9 }
 0xc43   : > { %v2086_v3 = vpop.eup %2085 }
 0xc44   : > { %v1608_v10 = vadd.f32 1.0, %v2086_v3 }
 0xc46   : > { %v1609_v12 = vmul.f32 %v1608_v10, %v1608_v10 }
 0xc48   : > { %v1612_v13 = vadd.f32 1.0, %v1609_v12  ;;  %v1837_v14 = vadd.f32 -1.0, %v1609_v12 }
 0xc4a   : > { %2087 = vrcp.f32 %v1612_v13  ;;  %v1611_v15 = vmul.f32 %v1837_v14, %v1602_v4 }
 0xc54   : > { %v2088_v16 = vpop.eup %2087 }
 0xc55   : > { %v1614_v17 = vmul.f32 %v2088_v16, %v1611_v15 }
 0xc57   : > { %1988 = vmatmul.mubr.msk.f32.vlgmr.msra.gmra.mrb[12].mxu1 %vm1630_vm3, %v1614_v17 }
 0xd2a   : > { %v1700_v19 = vpop.f32.mrb[12].mxu1 }
 0xd2b   : > { %v1701_v20 = vadd.f32 %v1838_v18, %v1700_v19  ;;  %v1989_v11 = vpop.f32.mrb[13].mxu1 }
 0xd2d   : > { %v1704_v21 = vadd.f32 %v1701_v20, %v1520_v52 }
 0xd2f   : > { %v1707_v22 = vsel %vm448_vm1, %v1704_v21, 0.0 }
 0xd30   : > { %1708 = vadd.xlane.f32.xlu1 %v1707_v22 }
 0xdbd   : > { %v1709_v23 = vpop.xlane.xlu1 %1708 }
 0xdbe   : > { %v1710_v24 = vmul.f32 0.03125, %v1709_v23 }
 0xdc0   : > { %v1711_v25 = vsub.f32 %v1704_v21, %v1710_v24 }
 0xdc2   : > { %v1712_v26 = vmul.f32 %v1711_v25, %v1711_v25 }
 0xdc4   : > { %v1713_v27 = vsel %vm448_vm1, %v1712_v26, 0.0 }
 0xdc5   : > { %1714 = vadd.xlane.f32.xlu1 %v1713_v27 }
 0xe52   : > { %v1715_v28 = vpop.xlane.xlu1 %1714 }
 0xe53   : > { %v1716_v29 = vmul.f32 0.03125, %v1715_v28 }
 0xe55   : > { %v1717_v30 = vadd.f32 1e-06, %v1716_v29 }
 0xe57   : > { %2089 = vrsqrt.f32 %v1717_v30 }
 0xe61   : > { %v2090_v31 = vpop.eup %2089 }
 0xe62   : > { %v1719_v33 = vmul.f32 %v2090_v31, %v1711_v25 }
 0xe64   : > { %v1726_v35 = vmul.f32 %v1840_v32, %v1719_v33 }
 0xe66   : > { %v1733_v36 = vadd.f32 %v1841_v34, %v1726_v35 }
 0xe68   : > { %1734 = vst.msk [vmem:[%s431_s23] sm:$0xff] %vm448_vm1, %v1733_v36 }
 0xe69   : > { %2104 = shalt.err (!%p2101_p3)
}
 0xe6a   : > { %s2105_s1 = scalar_lea.hbm %s2483_s3, 128  ;;  %s2109_s21 = scalar_lea.hbm %s2539_s13, 256 }
 0xe6b   : > { %p2106_p4 = scmp.ne.s32.totalorder %s2483_s3, %s2105_s1  ;;  %p2110_p9 = scmp.lt.u32.totalorder %s2483_s3, %s2539_s13 }
 0xe6c   : > { %p2111_p10 = scmp.lt.u32.totalorder %s2109_s21, %s2105_s1  ;;  %p2113_p12 = scmp.lt.u32.totalorder %s2105_s1, %s2483_s3 }
 0xe6d   : > { %p2107_p7 = pnand %p2106_p4, %p2278_p5 }
 0xe6e   : > { %p2112_p11 = por %p2111_p10, %p2110_p9 }
 0xe6f   : > { %p2108_p8 = pneg %p2107_p7 }
 0xe70   : > { %p2114_p13 = por %p2113_p12, %p2112_p11 }
 0xe72   : > { %p2115_p0 = pnand %p2114_p13, %p2108_p8 }
 0xe74   : > { %2118 = shalt.err (!%p2115_p0)
}
 0xe75   : > { %2014 = dma.vmem_to_hbm [thread:$0]  (%p2278_p5), %s2485_s0, 128, %s2483_s3, %s1736_s15  }
 0xe76 PF: > { %p2020_p1 = scmp.ge.s32.totalorder %s2153_s28, 2  ;;  %s1761_s16 = sand.u32 1, %s2141_s25  }
 0xe77   : > { %s1762_s29 = scalar_lea.sflag [#allocation3], %s1761_s16 }
 0xe78   : > { %p2017_p2 = pnand %p2020_p1, %p2282_p6 }
 0xe7a   : > { %2136 = dma.done.wait (!%p2017_p2), %s1762_s29, 128  }
 0xe7b   : > { %2138 = vsyncadd (!%p2017_p2), %s1762_s29, 4294967168  ;;  %p23_p3 = scmp.ge.s32.totalorder %s2265_s14, 4   ;;  %s2550_s25 = smov %s2145_s26 }
 0xe7c   : > { %s2551_s26 = smov %s2149_s27  ;;  %s2552_s27 = smov %s2276_s17 }
 0xe7d   : > { %s2553_s28 = smov %s2265_s14  ;;  %25 = sbr.rel (!%p23_p3) target bundleno = 8 (0x8), region = 107 }
 0xe84   :  { %1767 = vsyncpa [#allocation3], 1 }
 0xe85   :  { %1769 = vsyncpa [#allocation3 + $0x1], 1 }

// kernel: chaotic_encoder_forward.4
= control target key start
LH: loop header
LB: loop body
LE: loop exit
PB: predicated region body
PF: predicated region fallthrough
CT: control target
= control target key end

     0   :  { %s2131_s25 = smov 0   ;;  %s2341_s0 = inlined_call_operand.vmem [shape: f32[2,8,32], index: 0, kind: input, shape index: {}]   ;;  %s2342_s1 = inlined_call_operand.vmem [shape: f32[32,96], index: 1, kind: input, shape index: {}]   ;;  %s2343_s2 = inlined_call_operand.vmem [shape: f32[1,96], index: 2, kind: input, shape index: {}]   ;;  %s2344_s3 = inlined_call_operand.vmem [shape: f32[32,32], index: 3, kind: input, shape index: {}]   ;;  %s2345_s4 = inlined_call_operand.vmem [shape: f32[1,32], index: 4, kind: input, shape index: {}]   ;;  %s2346_s5 = inlined_call_operand.vmem [shape: f32[32,64], index: 5, kind: input, shape index: {}]   ;;  %s2347_s6 = inlined_call_operand.vmem [shape: f32[1,64], index: 6, kind: input, shape index: {}]   ;;  %s2348_s7 = inlined_call_operand.vmem [shape: f32[64,32], index: 7, kind: input, shape index: {}]   ;;  %s2349_s8 = inlined_call_operand.vmem [shape: f32[1,32], index: 8, kind: input, shape index: {}]   ;;  %s2350_s9 = inlined_call_operand.vmem [shape: f32[1,32], index: 9, kind: input, shape index: {}]   ;;  %s2351_s10 = inlined_call_operand.vmem [shape: f32[1,32], index: 10, kind: input, shape index: {}]   ;;  %s2352_s11 = inlined_call_operand.vmem [shape: f32[1,32], index: 11, kind: input, shape index: {}]   ;;  %s2353_s12 = inlined_call_operand.vmem [shape: f32[1,32], index: 12, kind: input, shape index: {}]   ;;  %s2354_s13 = inlined_call_operand.vmem [shape: f32[2,8,32], index: 13, kind: output, shape index: {}]  }
   0x1 LB: > { %s1788_s26 = sadd.s32 4294967295, %s2045_s25   ;;  %p1792_p0 = scmp.ge.s32.totalorder %s2045_s25, 1  ;;  %s2045_s25 = sphi %s2131_s25, %s23_s25  }
   0x2   : > { %p386_p1 = scmp.lt.s32.totalorder %s2045_s25, 3 }
   0x4   : > { %p387_p2 = pnand %p1792_p0, %p386_p1 }
   0x5   : > { %v437_v0 = vld [vmem:[%s2342_s1] sm:$0xff] (!%p387_p2)  ;;  %v438_v1 = vld [vmem:[%s2342_s1 + $0x8] sm:$0xff] (!%p387_p2)  ;;  %v439_v2 = vld [vmem:[%s2342_s1 + $0x10] sm:$0xff] (!%p387_p2)  ;;  %v2047_v3 = vmov (!%p387_p2), 0.0|0.0   ;;  %vm2048_vm0 = vmmov (!%p387_p2), 0   ;;  %v2049_v6 = vmov (!%p387_p2), 0.0  }
   0x6   : > { %390 = sbr.rel (%p387_p2) target bundleno = 3672 (0xe58), region = 72  ;;  %1969 = vmatprep.subr.bf16.mxu0 (!%p387_p2), %v2047_v3  ;;  %v1970_v4 = vpack.c.bf16 (!%p387_p2), %v438_v1, %v437_v0  ;;  %v440_v5 = vld [vmem:[%s2342_s1 + $0x18] sm:$0xff] (!%p387_p2)  ;;  %1876 = vmatprep.mubr.msk.f32.mxu0 (!%p387_p2), %vm2048_vm0, %v2049_v6  ;;  %p428_p3 = scmp.lt.s32.totalorder (!%p387_p2), %s1788_s26, 1  ;;  %vm448_vm1 = vcmask (!%p387_p2), 261120   ;;  %v1795_v9 = vld [vmem:[%s2343_s2] ss:$0 sm:$0xff] (!%p387_p2) }
   0x7   : > { %1884 = vmatprep.subr.mxu1 (!%p387_p2), %v2049_v6  ;;  %1886 = vmatprep.mubr.msk.f32.mxu1 (!%p387_p2), %vm2048_vm0, %v2049_v6  ;;  %v1973_v7 = vpack.c.bf16 (!%p387_p2), %v440_v5, %v439_v2  ;;  %s2050_s24 = smov (!%p387_p2), 96   ;;  %s2051_s27 = smov (!%p387_p2), 120   ;;  %vm530_vm2 = vcmask (!%p387_p2), 64512   ;;  %v524_v33 = vld [vmem:[%s2344_s3 + $0x8] sm:$0xff] (!%p387_p2)  ;;  %v523_v42 = vld [vmem:[%s2344_s3] sm:$0xff] (!%p387_p2)  ;;  %v525_v5 = vld [vmem:[%s2344_s3 + $0x10] sm:$0xff] (!%p387_p2) }
   0x8   : > { %1971 = vmatpush3.bf16.msra.mxu0 (!%p387_p2), %v1970_v4  ;;  %s2052_s28 = smov (!%p387_p2), 88   ;;  %s2053_s29 = smov (!%p387_p2), 56   ;;  %vm1630_vm3 = vcmask (!%p387_p2), 523264  }
   0x9   : > { %1972 = vmatprep.subr.bf16.mxu0 (!%p387_p2), %v2047_v3  ;;  %s2054_s30 = smov (!%p387_p2), 64   ;;  %s2055_s14 = smov (!%p387_p2), 80  }
   0xa   : > { %s2056_s15 = smov (!%p387_p2), 112   ;;  %s2058_s22 = smov (!%p387_p2), 104  }
   0xb   : > { %s2059_s23 = smov (!%p387_p2), 48  }
   0xc   : > { %1974 = vmatpush3.bf16.msra.mxu0 (!%p387_p2), %v1973_v7 }
   0xd   : > { %s2356_s26 = smov (!%p428_p3, %s1788_s26), 1  ;;  %1879 = vmatprep.subr.mxu0 %v2049_v6 }
   0xe   : > { %s1793_s18 = sshll.u32 %s2356_s26, 3 }
   0xf   : > { %s431_s21 = scalar_lea.vmem %s2341_s0, %s1793_s18 }
  0x10   : > { %v2166_v8 = vld [vmem:[%s431_s21] sm:$0xff]  ;;  %s2057_s21 = smov 72  }
  0x11   : > { %1877 = vmatmul.mubr.msk.f32.vlgmr.msra.gmra.mrb[0].mxu0 %vm448_vm1, %v2166_v8 }
  0x12   : > { %1881 = vmatprep.mubr.msk.f32.mxu0 %vm2048_vm0, %v2049_v6 }
  0xe4   : > { %v518_v10 = vpop.f32.mrb[0].mxu0 }
  0xe5   : > { %v2176_v11 = vadd.f32 %v1795_v9, %v518_v10  ;;  %v1878_v12 = vpop.f32.mrb[1].mxu0 }
  0xe7   : > { %528 = vrot.lane.b32.xlu0 %v2176_v11, %s2050_s24  ;;  %v2180_v13 = vmul.f32 0.35355338, %v2176_v11 }
  0xe9   : > { %693 = vrot.lane.b32.xlu1 %v2180_v13, %s2051_s27 }
  0xeb   : > { %695 = vrot.lane.b32.xlu0 %v2176_v11, %s2052_s28  ;;  %s2060_s28 = smov 40  }
 0x159   : > { %v529_v14 = vpop.permute.xlu0 %528 }
 0x15a   : > { %1880 = vmatpush3.xpose.msk.msra.mxu0 %vm530_vm2, %v529_v14 }
 0x15b   : > { %1889 = vmatprep.subr.mxu0 %v2049_v6  ;;  %v694_v16 = vpop.permute.xlu1 %693 }
 0x15d   : > { %v696_v15 = vpop.permute.xlu0 %695  ;;  %1882 = vmatmul.mubr.msk.f32.vlgmr.msra.gmra.mrb[2].mxu0 %vm530_vm2, %v2180_v13 }
 0x15e   : > { %1890 = vmatpush3.xpose.msk.msra.mxu0 %vm530_vm2, %v696_v15  ;;  %1891 = vmatprep.mubr.msk.f32.mxu0 %vm2048_vm0, %v2049_v6 }
 0x15f   : > { %1899 = vmatprep.subr.mxu0 %v2049_v6 }
 0x161   : > { %1892 = vmatmul.mubr.msk.f32.vlgmr.msra.gmra.mrb[4].mxu0 %vm530_vm2, %v694_v16 }
 0x162   : > { %1901 = vmatprep.mubr.msk.f32.mxu0 %vm2048_vm0, %v2049_v6  ;;  %1900 = vmatpush3.msra.mxu0 %v524_v33 }
 0x163   : > { %1909 = vmatprep.subr.mxu0 %v2049_v6 }
 0x230   : > { %v602_v17 = vpop.f32.mrb[2].mxu0 }
 0x231   : > { %v1883_v18 = vpop.f32.mrb[3].mxu0  ;;  %v606_v19 = vsel %vm530_vm2, %v602_v17, -inf }
 0x232   : > { %607 = vmax.xlane.f32.xlu1 %v606_v19 }
 0x234   : > { %v767_v20 = vpop.f32.mrb[4].mxu0 }
 0x235   : > { %v1893_v21 = vpop.f32.mrb[5].mxu0  ;;  %v771_v22 = vsel %vm530_vm2, %v767_v20, -inf }
 0x236   : > { %772 = vmax.xlane.f32.xlu0 %v771_v22 }
 0x2bf   : > { %v608_v23 = vpop.xlane.xlu1 %607 }
 0x2c0   : > { %v609_v24 = vsub.f32 %v602_v17, %v608_v23 }
 0x2c2   : > { %v610_v25 = vmul.f32 1.442695, %v609_v24 }
 0x2c3   : > { %v773_v26 = vpop.xlane.xlu0 %772 }
 0x2c4   : > { %2015 = vpow2.f32 %v610_v25  ;;  %v774_v27 = vsub.f32 %v767_v20, %v773_v26  ;;  %v526_v20 = vld [vmem:[%s2344_s3 + $0x18] sm:$0xff] }
 0x2c6   : > { %v775_v28 = vmul.f32 1.442695, %v774_v27 }
 0x2c8   : > { %2017 = vpow2.f32 %v775_v28 }
 0x2ce   : > { %v2016_v29 = vpop.eup %2015 }
 0x2cf   : > { %v612_v30 = vsel %vm530_vm2, %v2016_v29, 0.0 }
 0x2d0   : > { %613 = vadd.xlane.f32.xlu0 %v612_v30 }
 0x2d2   : > { %v2018_v31 = vpop.eup %2017 }
 0x2d3   : > { %v777_v32 = vsel %vm530_vm2, %v2018_v31, 0.0 }
 0x2d4   : > { %778 = vadd.xlane.f32.xlu1 %v777_v32 }
 0x2e5   : > { %782 = vrot.lane.b32.xlu1 %v2176_v11, %s2053_s29  ;;  %s435_s29 = scalar_lea.vmem %s2354_s13, %s1793_s18 }
 0x2e6   : > { %617 = vrot.lane.b32.xlu0 %v2176_v11, %s2054_s30 }
 0x2e9   : > { %1006 = vrot.lane.b32.xlu1 %v2176_v11, %s2055_s14 }
 0x2ea   : > { %1004 = vrot.lane.b32.xlu0 %v2180_v13, %s2056_s15 }
 0x35d   : > { %v614_v34 = vpop.xlane.xlu0 %613 }
 0x35e   : > { %2019 = vrcp.f32 %v614_v34 }
 0x361   : > { %v779_v35 = vpop.xlane.xlu1 %778  ;;  %v618_v36 = vpop.permute.xlu0 %617 }
 0x362   : > { %2021 = vrcp.f32 %v779_v35  ;;  %1885 = vmatpush3.msra.mxu1 %v618_v36 }
 0x363   : > { %1894 = vmatprep.subr.mxu1 %v2049_v6 }
 0x365   : > { %v783_v39 = vpop.permute.xlu1 %782  ;;  %v1005_v48 = vpop.permute.xlu0 %1004 }
 0x368   : > { %v2020_v37 = vpop.eup %2019 }
 0x369   : > { %v616_v38 = vmul.f32 %v2020_v37, %v2016_v29  ;;  %v1007_v46 = vpop.permute.xlu1 %1006  ;;  %v1813_v29 = vld [vmem:[%s2345_s4] ss:$0 sm:$0xff] }
 0x36b   : > { %1887 = vmatmul.mubr.msk.f32.vlgmr.msra.gmra.mrb[0].mxu1 %vm530_vm2, %v616_v38 }
 0x36c   : > { %v2022_v40 = vpop.eup %2021  ;;  %1895 = vmatpush3.msra.mxu1 %v783_v39  ;;  %1896 = vmatprep.mubr.msk.f32.mxu1 %vm2048_vm0, %v2049_v6 }
 0x36d   : > { %v781_v41 = vmul.f32 %v2022_v40, %v2018_v31  ;;  %1904 = vmatprep.subr.mxu1 %v2049_v6  ;;  %v1522_v40 = vld [vmem:[%s2346_s5 + $0x8] sm:$0xff] }
 0x36f   : > { %1897 = vmatmul.mubr.msk.f32.vlgmr.msra.gmra.mrb[2].mxu1 %vm530_vm2, %v781_v41 }
 0x370   : > { %1906 = vmatprep.mubr.msk.f32.mxu1 %vm2048_vm0, %v2049_v6  ;;  %1905 = vmatpush3.msra.mxu1 %v523_v42  ;;  %v1524_v42 = vld [vmem:[%s2346_s5 + $0x18] sm:$0xff] }
 0x371   : > { %1914 = vmatprep.subr.mxu1 %v2049_v6 }
 0x43e   : > { %v689_v43 = vpop.f32.mrb[0].mxu1 }
 0x43f   : > { %v1888_v44 = vpop.f32.mrb[1].mxu1  ;;  %1907 = vmatmul.mubr.msk.f32.vlgmr.msra.gmra.mrb[4].mxu1 %vm530_vm2, %v689_v43 }
 0x440   : > { %1916 = vmatprep.mubr.msk.f32.mxu1 %vm2048_vm0, %v2049_v6 }
 0x442   : > { %v854_v45 = vpop.f32.mrb[2].mxu1 }
 0x443   : > { %v1898_v47 = vpop.f32.mrb[3].mxu1  ;;  %1902 = vmatmul.mubr.msk.f32.vlgmr.msra.gmra.mrb[6].mxu0 %vm530_vm2, %v854_v45 }
 0x444   : > { %1910 = vmatpush3.xpose.msk.msra.mxu0 %vm530_vm2, %v1007_v46  ;;  %1911 = vmatprep.mubr.msk.f32.mxu0 %vm2048_vm0, %v2049_v6 }
 0x445   : > { %1919 = vmatprep.subr.mxu0 %v2049_v6 }
 0x447   : > { %1912 = vmatmul.mubr.msk.f32.vlgmr.msra.gmra.mrb[8].mxu0 %vm530_vm2, %v1005_v48  ;;  %v1814_v48 = vld [vmem:[%s2350_s9] ss:$0 sm:$0xff] }
 0x448   : > { %1921 = vmatprep.mubr.msk.f32.mxu0 %vm2048_vm0, %v2049_v6  ;;  %1920 = vmatpush3.msra.mxu0 %v525_v5 }
 0x449   : > { %1929 = vmatprep.subr.mxu0 %v2049_v6 }
 0x512   : > { %v1000_v49 = vpop.f32.mrb[4].mxu1 }
 0x513   : > { %v1908_v50 = vpop.f32.mrb[5].mxu1 }
 0x514   : > { %v1815_v50 = vld [vmem:[%s2351_s10] ss:$0 sm:$0xff] }
 0x516   : > { %v927_v51 = vpop.f32.mrb[6].mxu0 }
 0x517   : > { %v1001_v52 = vadd.f32 %v1000_v49, %v927_v51  ;;  %v1903_v53 = vpop.f32.mrb[7].mxu0 }
 0x518   : > { %v1615_v53 = vld [vmem:[%s2348_s7] sm:$0xff] }
 0x51a   : > { %v1078_v54 = vpop.f32.mrb[8].mxu0 }
 0x51b   : > { %v1913_v55 = vpop.f32.mrb[9].mxu0  ;;  %v1082_v56 = vsel %vm530_vm2, %v1078_v54, -inf }
 0x51c   : > { %1083 = vmax.xlane.f32.xlu1 %v1082_v56  ;;  %v1617_v56 = vld [vmem:[%s2348_s7 + $0x10] sm:$0xff] }
 0x52d   : > { %1245 = vrot.lane.b32.xlu1 %v2176_v11, %s2057_s21 }
 0x531   : > { %1243 = vrot.lane.b32.xlu1 %v2180_v13, %s2058_s22 }
 0x5a9   : > { %v1084_v57 = vpop.xlane.xlu1 %1083 }
 0x5aa   : > { %v1085_v58 = vsub.f32 %v1078_v54, %v1084_v57  ;;  %v1616_v54 = vld [vmem:[%s2348_s7 + $0x8] sm:$0xff]  ;;  %v1618_v57 = vld [vmem:[%s2348_s7 + $0x18] sm:$0xff] }
 0x5ab   : > { %v1982_v55 = vpack.c.bf16 %v1616_v54, %v1615_v53 }
 0x5ac   : > { %v1086_v59 = vmul.f32 1.442695, %v1085_v58  ;;  %v1985_v58 = vpack.c.bf16 %v1618_v57, %v1617_v56 }
 0x5ad   : > { %v1246_v1 = vpop.permute.xlu1 %1245 }
 0x5ae   : > { %2023 = vpow2.f32 %v1086_v59  ;;  %v1619_v59 = vld [vmem:[%s2348_s7 + $0x20] sm:$0xff] }
 0x5b1   : > { %v1244_v4 = vpop.permute.xlu1 %1243 }
 0x5b8   : > { %v2024_v60 = vpop.eup %2023 }
 0x5b9   : > { %v1088_v61 = vsel %vm530_vm2, %v2024_v60, 0.0 }
 0x5ba   : > { %1089 = vadd.xlane.f32.xlu0 %v1088_v61 }
 0x5d0   : > { %1093 = vrot.lane.b32.xlu0 %v2176_v11, %s2059_s23 }
 0x647   : > { %v1090_v62 = vpop.xlane.xlu0 %1089 }
 0x648   : > { %2025 = vrcp.f32 %v1090_v62  ;;  %v1621_v62 = vld [vmem:[%s2348_s7 + $0x30] sm:$0xff] }
 0x64b   : > { %v1094_v63 = vpop.permute.xlu0 %1093 }
 0x64c   : > { %1915 = vmatpush3.msra.mxu1 %v1094_v63  ;;  %v1622_v63 = vld [vmem:[%s2348_s7 + $0x38] sm:$0xff] }
 0x64d   : > { %1924 = vmatprep.subr.mxu1 %v2049_v6 }
 0x652   : > { %v2026_v0 = vpop.eup %2025 }
 0x653   : > { %v1092_v2 = vmul.f32 %v2026_v0, %v2024_v60  ;;  %v1620_v60 = vld [vmem:[%s2348_s7 + $0x28] sm:$0xff]  ;;  %v1991_v0 = vpack.c.bf16 %v1622_v63, %v1621_v62 }
 0x654   : > { %v1988_v61 = vpack.c.bf16 %v1620_v60, %v1619_v59 }
 0x655   : > { %1917 = vmatmul.mubr.msk.f32.vlgmr.msra.gmra.mrb[6].mxu1 %vm530_vm2, %v1092_v2 }
 0x656   : > { %1925 = vmatpush3.xpose.msk.msra.mxu1 %vm530_vm2, %v1246_v1  ;;  %1926 = vmatprep.mubr.msk.f32.mxu1 %vm2048_vm0, %v2049_v6  ;;  %v1816_v1 = vld [vmem:[%s2347_s6] ss:$0 sm:$0xff] }
 0x657   : > { %1934 = vmatprep.subr.mxu1 %v2049_v6 }
 0x659   : > { %1927 = vmatmul.mubr.msk.f32.vlgmr.msra.gmra.mrb[8].mxu1 %vm530_vm2, %v1244_v4 }
 0x65a   : > { %1936 = vmatprep.mubr.msk.f32.mxu1 %vm2048_vm0, %v2049_v6  ;;  %1935 = vmatpush3.msra.mxu1 %v526_v20 }
 0x65b   : > { %1981 = vmatprep.subr.bf16.mxu1 %v2047_v3 }
 0x728   : > { %v1165_v7 = vpop.f32.mrb[6].mxu1 }
 0x729   : > { %v1918_v9 = vpop.f32.mrb[7].mxu1  ;;  %1922 = vmatmul.mubr.msk.f32.vlgmr.msra.gmra.mrb[10].mxu0 %vm530_vm2, %v1165_v7 }
 0x72a   : > { %1931 = vmatprep.mubr.msk.f32.mxu0 %vm2048_vm0, %v2049_v6 }
 0x72c   : > { %v1317_v10 = vpop.f32.mrb[8].mxu1 }
 0x72d   : > { %v1928_v12 = vpop.f32.mrb[9].mxu1  ;;  %v1321_v13 = vsel %vm530_vm2, %v1317_v10, -inf }
 0x72e   : > { %1322 = vmax.xlane.f32.xlu0 %v1321_v13 }
 0x744   : > { %1332 = vrot.lane.b32.xlu0 %v2176_v11, %s2060_s28 }
 0x7bb   : > { %v1323_v14 = vpop.xlane.xlu0 %1322 }
 0x7bc   : > { %v1324_v15 = vsub.f32 %v1317_v10, %v1323_v14 }
 0x7be   : > { %v1325_v16 = vmul.f32 1.442695, %v1324_v15 }
 0x7bf   : > { %v1333_v17 = vpop.permute.xlu0 %1332 }
 0x7c0   : > { %2027 = vpow2.f32 %v1325_v16  ;;  %1930 = vmatpush3.msra.mxu0 %v1333_v17 }
 0x7c1   : > { %1975 = vmatprep.subr.bf16.mxu0 %v2047_v3 }
 0x7ca   : > { %v2028_v18 = vpop.eup %2027 }
 0x7cb   : > { %v1327_v19 = vsel %vm530_vm2, %v2028_v18, 0.0 }
 0x7cc   : > { %1328 = vadd.xlane.f32.xlu1 %v1327_v19 }
 0x7fc   : > { %v1238_v11 = vpop.f32.mrb[10].mxu0 }
 0x7fd   : > { %v1242_v21 = vadd.f32 %v1238_v11, %v1001_v52  ;;  %v1923_v22 = vpop.f32.mrb[11].mxu0 }
 0x859   : > { %v1329_v23 = vpop.xlane.xlu1 %1328 }
 0x85a   : > { %2029 = vrcp.f32 %v1329_v23 }
 0x864   : > { %v2030_v24 = vpop.eup %2029 }
 0x865   : > { %v1331_v25 = vmul.f32 %v2030_v24, %v2028_v18  ;;  %v1819_v18 = vld [vmem:[%s2349_s8] ss:$0 sm:$0xff] }
 0x867   : > { %1932 = vmatmul.mubr.msk.f32.vlgmr.msra.gmra.mrb[12].mxu0 %vm530_vm2, %v1331_v25 }
 0x868   : > { %1947 = vmatprep.mubr.msk.f32.mxu0 %vm2048_vm0, %v2049_v6 }
 0x93a   : > { %v1404_v26 = vpop.f32.mrb[12].mxu0 }
 0x93b   : > { %v1933_v27 = vpop.f32.mrb[13].mxu0  ;;  %1937 = vmatmul.mubr.msk.f32.vlgmr.msra.gmra.mrb[10].mxu1 %vm530_vm2, %v1404_v26 }
 0x93c   : > { %1966 = vmatprep.mubr.msk.f32.mxu1 %vm2048_vm0, %v2049_v6  ;;  %v1521_v6 = vld [vmem:[%s2346_s5] sm:$0xff]  ;;  %1983 = vmatpush3.bf16.msra.mxu1 %v1982_v55 }
 0x93d   : > { %v1976_v41 = vpack.c.bf16 %v1522_v40, %v1521_v6  ;;  %1984 = vmatprep.subr.bf16.mxu1 %v2047_v3 }
 0x93f   : > { %1977 = vmatpush3.bf16.msra.mxu0 %v1976_v41 }
 0x940   : > { %1978 = vmatprep.subr.bf16.mxu0 %v2047_v3  ;;  %1986 = vmatpush3.bf16.msra.mxu1 %v1985_v58 }
 0x941   : > { %1987 = vmatprep.subr.bf16.mxu1 %v2047_v3 }
 0x944   : > { %1989 = vmatpush3.bf16.msra.mxu1 %v1988_v61 }
 0x945   : > { %1990 = vmatprep.subr.bf16.mxu1 %v2047_v3 }
 0x948   : > { %1992 = vmatpush3.bf16.msra.mxu1 %v1991_v0 }
 0xa0e   : > { %v1477_v28 = vpop.f32.mrb[10].mxu1 }
 0xa0f   : > { %v1481_v30 = vadd.f32 %v1477_v28, %v1242_v21  ;;  %v1938_v31 = vpop.f32.mrb[11].mxu1 }
 0xa11   : > { %v1489_v32 = vadd.f32 %v1813_v29, %v1481_v30 }
 0xa13   : > { %v1490_v33 = vadd.f32 %v1489_v32, %v2166_v8  ;;  %v1523_v8 = vld [vmem:[%s2346_s5 + $0x10] sm:$0xff]  ;;  %v1821_v32 = vld [vmem:[%s2352_s11] ss:$0 sm:$0xff] }
 0xa14   : > { %v1979_v43 = vpack.c.bf16 %v1524_v42, %v1523_v8 }
 0xa15   : > { %v1493_v34 = vsel %vm448_vm1, %v1490_v33, 0.0 }
 0xa16   : > { %1494 = vadd.xlane.f32.xlu1 %v1493_v34  ;;  %1980 = vmatpush3.bf16.msra.mxu0 %v1979_v43  ;;  %v1822_v34 = vld [vmem:[%s2353_s12] ss:$0 sm:$0xff] }
 0xaa3   : > { %v1495_v35 = vpop.xlane.xlu1 %1494 }
 0xaa4   : > { %v1497_v36 = vmul.f32 0.03125, %v1495_v35 }
 0xaa6   : > { %v1498_v37 = vsub.f32 %v1490_v33, %v1497_v36 }
 0xaa8   : > { %v1499_v38 = vmul.f32 %v1498_v37, %v1498_v37 }
 0xaaa   : > { %v1500_v39 = vsel %vm448_vm1, %v1499_v38, 0.0 }
 0xaab   : > { %1501 = vadd.xlane.f32.xlu1 %v1500_v39 }
 0xb38   : > { %v1502_v44 = vpop.xlane.xlu1 %1501 }
 0xb39   : > { %v1503_v45 = vmul.f32 0.03125, %v1502_v44 }
 0xb3b   : > { %v1504_v46 = vadd.f32 1e-06, %v1503_v45 }
 0xb3d   : > { %2031 = vrsqrt.f32 %v1504_v46 }
 0xb47   : > { %v2032_v47 = vpop.eup %2031 }
 0xb48   : > { %v1506_v49 = vmul.f32 %v2032_v47, %v1498_v37 }
 0xb4a   : > { %v1513_v51 = vmul.f32 %v1814_v48, %v1506_v49 }
 0xb4c   : > { %v1520_v52 = vadd.f32 %v1815_v50, %v1513_v51 }
 0xb4e   : > { %1948 = vmatmul.mubr.msk.f32.vlgmr.msra.gmra.mrb[14].mxu0 %vm448_vm1, %v1520_v52 }
 0xc21   : > { %v1601_v2 = vpop.f32.mrb[14].mxu0 }
 0xc22   : > { %v1602_v4 = vadd.f32 %v1816_v1, %v1601_v2  ;;  %v1949_v5 = vpop.f32.mrb[15].mxu0 }
 0xc24   : > { %v1605_v7 = vmin.f32 %v1602_v4, 20.0 }
 0xc26   : > { %v1606_v9 = vmul.f32 1.442695, %v1605_v7 }
 0xc28   : > { %2033 = vpow2.f32 %v1606_v9 }
 0xc32   : > { %v2034_v3 = vpop.eup %2033 }
 0xc33   : > { %v1608_v10 = vadd.f32 1.0, %v2034_v3 }
 0xc35   : > { %v1609_v12 = vmul.f32 %v1608_v10, %v1608_v10 }
 0xc37   : > { %v1612_v13 = vadd.f32 1.0, %v1609_v12  ;;  %v1818_v14 = vadd.f32 -1.0, %v1609_v12 }
 0xc39   : > { %2035 = vrcp.f32 %v1612_v13  ;;  %v1611_v15 = vmul.f32 %v1818_v14, %v1602_v4 }
 0xc43   : > { %v2036_v16 = vpop.eup %2035 }
 0xc44   : > { %v1614_v17 = vmul.f32 %v2036_v16, %v1611_v15 }
 0xc46   : > { %1967 = vmatmul.mubr.msk.f32.vlgmr.msra.gmra.mrb[12].mxu1 %vm1630_vm3, %v1614_v17 }
 0xd19   : > { %v1700_v19 = vpop.f32.mrb[12].mxu1 }
 0xd1a   : > { %v1701_v20 = vadd.f32 %v1819_v18, %v1700_v19  ;;  %v1968_v11 = vpop.f32.mrb[13].mxu1 }
 0xd1c   : > { %v1704_v21 = vadd.f32 %v1701_v20, %v1520_v52 }
 0xd1e   : > { %v1707_v22 = vsel %vm448_vm1, %v1704_v21, 0.0 }
 0xd1f   : > { %1708 = vadd.xlane.f32.xlu1 %v1707_v22 }
 0xdac   : > { %v1709_v23 = vpop.xlane.xlu1 %1708 }
 0xdad   : > { %v1710_v24 = vmul.f32 0.03125, %v1709_v23 }
 0xdaf   : > { %v1711_v25 = vsub.f32 %v1704_v21, %v1710_v24 }
 0xdb1   : > { %v1712_v26 = vmul.f32 %v1711_v25, %v1711_v25 }
 0xdb3   : > { %v1713_v27 = vsel %vm448_vm1, %v1712_v26, 0.0 }
 0xdb4   : > { %1714 = vadd.xlane.f32.xlu1 %v1713_v27 }
 0xe41   : > { %v1715_v28 = vpop.xlane.xlu1 %1714 }
 0xe42   : > { %v1716_v29 = vmul.f32 0.03125, %v1715_v28 }
 0xe44   : > { %v1717_v30 = vadd.f32 1e-06, %v1716_v29 }
 0xe46   : > { %2037 = vrsqrt.f32 %v1717_v30 }
 0xe50   : > { %v2038_v31 = vpop.eup %2037 }
 0xe51   : > { %v1719_v33 = vmul.f32 %v2038_v31, %v1711_v25 }
 0xe53   : > { %v1726_v35 = vmul.f32 %v1821_v32, %v1719_v33 }
 0xe55   : > { %v1733_v36 = vadd.f32 %v1822_v34, %v1726_v35 }
 0xe57   : > { %1734 = vst.msk [vmem:[%s435_s29] sm:$0xff] %vm448_vm1, %v1733_v36 }
 0xe58 PF: > { %s23_s25 = sadd.s32 1, %s2045_s25  }
 0xe59   : > { %p20_p4 = scmp.ge.s32.totalorder %s23_s25, 4  }
 0xe5b   :  { %22 = sbr.rel (!%p20_p4) target bundleno = 1 (0x1), region = 102 }

</bundles_post_ra>
